<compile_context>
chip_gen: v7x
topology: tpu7x:2x2x1
jax: 0.10.0
libtpu: 0.0.40
codegen_flags: <defaults>
</compile_context>

<pallas_src>
import functools

import jax
import jax.numpy as jnp
from jax.experimental import pallas as pl
from jax.experimental.pallas import tpu as pltpu


def _round_up(x, m):
    return (x + m - 1) // m * m


def fold_bn(gamma, beta, mean, var, eps=1e-5):
    scale = gamma / jnp.sqrt(var + eps)
    bias = beta - mean * scale
    return scale, bias


# ----------------------------------------------------------------------------
# Fused kernel: conv1+bn1+relu -> conv2+bn2 -> (+shortcut) -> relu, per image.
# ----------------------------------------------------------------------------
def _make_block_kernel(Ho, Wo, Cin_p, Cout_p, stride, identity_shortcut):
    M = Ho * Wo
    nx = 1 if stride == 1 else 4   # stride=2: input pre-split into 4 parity phases

    def kernel(*refs):
        x_refs = refs[:nx]
        w1_ref, b1_ref, w2_ref, b2_ref = refs[nx:nx + 4]
        i = nx + 4
        if identity_shortcut:
            ws_ref = bs_ref = None
        else:
            ws_ref, bs_ref = refs[i:i + 2]
            i += 2
        o_ref, h_scr = refs[i], refs[i + 1]

        def x_tap(ky, kx):
            # Window of the zero-padded input feeding conv tap (ky, kx).
            if stride == 1:
                return x_refs[0][ky:ky + Ho, kx:kx + Wo, :]
            # stride=2: phase (ky%2, kx%2), offsets ky//2, kx//2 (plain slices).
            r = x_refs[(ky % 2) * 2 + (kx % 2)]
            return r[ky // 2:ky // 2 + Ho, kx // 2:kx // 2 + Wo, :]

        # --- conv1 (BN1 scale folded into w1) + bias + ReLU: 9 shifted matmuls.
        acc = jnp.zeros((M, Cout_p), jnp.float32)
        for ky in range(3):
            for kx in range(3):
                acc = acc + jnp.dot(x_tap(ky, kx).reshape(M, Cin_p),
                                    w1_ref[ky, kx],
                                    preferred_element_type=jnp.float32)
        out1 = jnp.maximum(acc + b1_ref[...], 0.0).astype(jnp.bfloat16)

        # --- stage out1 into zero-padded VMEM scratch (halo for conv2, padding=1).
        h_scr[...] = jnp.zeros_like(h_scr)
        h_scr[1:Ho + 1, 1:Wo + 1, :] = out1.reshape(Ho, Wo, Cout_p)

        # --- conv2 (BN2 scale folded) + bias.
        acc2 = jnp.zeros((M, Cout_p), jnp.float32)
        for ky in range(3):
            for kx in range(3):
                acc2 = acc2 + jnp.dot(
                    h_scr[ky:ky + Ho, kx:kx + Wo, :].reshape(M, Cout_p),
                    w2_ref[ky, kx],
                    preferred_element_type=jnp.float32)
        y = acc2 + b2_ref[...]

        # --- shortcut (identity or 1x1 strided conv + BN), residual add + ReLU.
        xc = x_tap(1, 1).reshape(M, Cin_p)      # == x[::stride, ::stride]
        if identity_shortcut:
            y = y + xc.astype(jnp.float32)
        else:
            y = y + jnp.dot(xc, ws_ref[...],
                            preferred_element_type=jnp.float32) + bs_ref[...]
        o_ref[...] = jnp.maximum(y, 0.0).reshape(Ho, Wo, Cout_p).astype(o_ref.dtype)

    return kernel


# ----------------------------------------------------------------------------
# BasicBlock forward
# ----------------------------------------------------------------------------
def basic_block_forward(x_nchw, params, *, stride):
    assert stride in (1, 2)
    N, Cin, H, W = x_nchw.shape
    Cout = params["conv1_w"].shape[0]
    Ho = (H + 2 - 3) // stride + 1
    Wo = (W + 2 - 3) // stride + 1
    Cin_p = _round_up(Cin, 128)
    Cout_p = _round_up(Cout, 128)
    identity_sc = (stride == 1 and Cin == Cout)

    # Glue (one pass): NCHW -> NHWC, bf16, +1 spatial zero pad, channel pad to 128.
    x = jnp.transpose(x_nchw, (0, 2, 3, 1)).astype(jnp.bfloat16)
    xp = jnp.pad(x, ((0, 0), (1, 1), (1, 1), (0, Cin_p - Cin)))
    if stride == 1:
        x_args = [xp]
    else:
        # (row,col)-parity phase split -> every stride-2 tap is a plain offset slice.
        x_args = [xp[:, r::2, c::2, :] for r in range(2) for c in range(2)]

    # Fold BN scales into f32 conv weights; only bias vectors enter the kernel.
    s1, b1 = fold_bn(params["bn1_gamma"], params["bn1_beta"],
                     params["bn1_mean"], params["bn1_var"])
    s2, b2 = fold_bn(params["bn2_gamma"], params["bn2_beta"],
                     params["bn2_mean"], params["bn2_var"])
    w1 = jnp.transpose(params["conv1_w"], (2, 3, 1, 0)) * s1      # (3,3,Cin,Cout)
    w2 = jnp.transpose(params["conv2_w"], (2, 3, 1, 0)) * s2      # (3,3,Cout,Cout)
    w1 = jnp.pad(w1, ((0, 0), (0, 0), (0, Cin_p - Cin), (0, Cout_p - Cout))).astype(jnp.bfloat16)
    w2 = jnp.pad(w2, ((0, 0), (0, 0), (0, Cout_p - Cout), (0, Cout_p - Cout))).astype(jnp.bfloat16)
    b1p = jnp.pad(b1, (0, Cout_p - Cout)).reshape(1, Cout_p).astype(jnp.float32)
    b2p = jnp.pad(b2, (0, Cout_p - Cout)).reshape(1, Cout_p).astype(jnp.float32)

    args = list(x_args) + [w1, b1p, w2, b2p]
    if not identity_sc:
        ss, bs = fold_bn(params["sc_gamma"], params["sc_beta"],
                         params["sc_mean"], params["sc_var"])
        ws = params["sc_w"].reshape(Cout, Cin).T * ss             # (Cin, Cout)
        ws = jnp.pad(ws, ((0, Cin_p - Cin), (0, Cout_p - Cout))).astype(jnp.bfloat16)
        bsp = jnp.pad(bs, (0, Cout_p - Cout)).reshape(1, Cout_p).astype(jnp.float32)
        args += [ws, bsp]

    # Activations blocked per image (grid axis N, megacore-parallel); weights and
    # biases use a constant block index -> DMA'd once and kept VMEM-resident.
    x_specs = [pl.BlockSpec((None,) + a.shape[1:], lambda n: (n, 0, 0, 0))
               for a in x_args]
    p_specs = [pl.BlockSpec(w1.shape, lambda n: (0, 0, 0, 0)),
               pl.BlockSpec(b1p.shape, lambda n: (0, 0)),
               pl.BlockSpec(w2.shape, lambda n: (0, 0, 0, 0)),
               pl.BlockSpec(b2p.shape, lambda n: (0, 0))]
    if not identity_sc:
        p_specs += [pl.BlockSpec(ws.shape, lambda n: (0, 0)),
                    pl.BlockSpec(bsp.shape, lambda n: (0, 0))]

    flops = 2 * N * Ho * Wo * 9 * (Cin_p + Cout_p) * Cout_p
    if not identity_sc:
        flops += 2 * N * Ho * Wo * Cin_p * Cout_p
    bytes_accessed = int(sum(a.size * a.dtype.itemsize for a in args)) \
        + N * Ho * Wo * Cout_p * 2

    out = pl.pallas_call(
        _make_block_kernel(Ho, Wo, Cin_p, Cout_p, stride, identity_sc),
        out_shape=jax.ShapeDtypeStruct((N, Ho, Wo, Cout_p), jnp.bfloat16),
        grid=(N,),
        in_specs=x_specs + p_specs,
        out_specs=pl.BlockSpec((None, Ho, Wo, Cout_p), lambda n: (n, 0, 0, 0)),
        scratch_shapes=[pltpu.VMEM((Ho + 2, Wo + 2, Cout_p), jnp.bfloat16)],
        compiler_params=pltpu.CompilerParams(dimension_semantics=("parallel",)),
        cost_estimate=pl.CostEstimate(flops=flops, transcendentals=0,
                                      bytes_accessed=bytes_accessed),
    )(*args)

    out = out[..., :Cout]                                     # drop channel padding
    return jnp.transpose(out, (0, 3, 1, 2)).astype(jnp.float32)   # NHWC -> NCHW


# ----------------------------------------------------------------------------
# Pure-JAX reference (matches the PyTorch BasicBlock forward) for validation.
# ----------------------------------------------------------------------------
def _reference_forward(x, params, *, stride):
    dn = ("NCHW", "OIHW", "NCHW")

    def bn(y, g, b, m, v, eps=1e-5):
        s = g / jnp.sqrt(v + eps)
        return y * s[None, :, None, None] + (b - m * s)[None, :, None, None]

    out = jax.lax.conv_general_dilated(x, params["conv1_w"], (stride, stride),
                                       ((1, 1), (1, 1)), dimension_numbers=dn)
    out = jax.nn.relu(bn(out, params["bn1_gamma"], params["bn1_beta"],
                         params["bn1_mean"], params["bn1_var"]))
    out = jax.lax.conv_general_dilated(out, params["conv2_w"], (1, 1),
                                       ((1, 1), (1, 1)), dimension_numbers=dn)
    out = bn(out, params["bn2_gamma"], params["bn2_beta"],
             params["bn2_mean"], params["bn2_var"])
    if "sc_w" in params:
        sc = jax.lax.conv_general_dilated(x, params["sc_w"], (stride, stride),
                                          ((0, 0), (0, 0)), dimension_numbers=dn)
        sc = bn(sc, params["sc_gamma"], params["sc_beta"],
                params["sc_mean"], params["sc_var"])
    else:
        sc = x
    return jax.nn.relu(out + sc)


# ----------------------------------------------------------------------------
# Deterministic parameter initialization (shapes from BasicBlock.__init__)
# ----------------------------------------------------------------------------
def init_params(key, in_planes, planes, stride):
    ks = jax.random.split(key, 8)
    p = {
        "conv1_w": 0.1 * jax.random.normal(ks[0], (planes, in_planes, 3, 3), jnp.float32),
        "bn1_gamma": 1.0 + 0.1 * jax.random.normal(ks[1], (planes,), jnp.float32),
        "bn1_beta": 0.1 * jax.random.normal(ks[2], (planes,), jnp.float32),
        "bn1_mean": jnp.zeros((planes,), jnp.float32),
        "bn1_var": jnp.ones((planes,), jnp.float32),
        "conv2_w": 0.1 * jax.random.normal(ks[3], (planes, planes, 3, 3), jnp.float32),
        "bn2_gamma": 1.0 + 0.1 * jax.random.normal(ks[4], (planes,), jnp.float32),
        "bn2_beta": 0.1 * jax.random.normal(ks[5], (planes,), jnp.float32),
        "bn2_mean": jnp.zeros((planes,), jnp.float32),
        "bn2_var": jnp.ones((planes,), jnp.float32),
    }
    if stride != 1 or in_planes != planes:
        p.update({
            "sc_w": 0.1 * jax.random.normal(ks[6], (planes, in_planes, 1, 1), jnp.float32),
            "sc_gamma": jnp.ones((planes,), jnp.float32),
            "sc_beta": jnp.zeros((planes,), jnp.float32),
            "sc_mean": jnp.zeros((planes,), jnp.float32),
            "sc_var": jnp.ones((planes,), jnp.float32),
        })
    return p


if __name__ == "__main__":
    key = jax.random.PRNGKey(0)
    kx, kp1, kp2 = jax.random.split(key, 3)

    # Case 1: downsampling block (stride=2, channel expansion) -> conv shortcut.
    in_planes, planes, stride = 4, 8, 2
    x = jax.random.normal(kx, (2, in_planes, 16, 16), jnp.float32)
    params = init_params(kp1, in_planes, planes, stride)
    fwd = jax.jit(functools.partial(basic_block_forward, stride=stride))
    out = fwd(x, params)
    jax.block_until_ready(out)
    assert out.shape == (2, planes, 8, 8), out.shape
    assert bool(jnp.all(out >= 0.0))              # final ReLU
    assert bool(jnp.all(jnp.isfinite(out)))
    ref = _reference_forward(x, params, stride=stride)
    assert bool(jnp.allclose(out, ref, atol=1e-1, rtol=1e-1)), \
        float(jnp.max(jnp.abs(out - ref)))

    # Case 2: identity shortcut block (stride=1, same channels).
    in_planes2, planes2, stride2 = 8, 8, 1
    x2 = jax.random.normal(kx, (2, in_planes2, 16, 16), jnp.float32)
    params2 = init_params(kp2, in_planes2, planes2, stride2)
    fwd2 = jax.jit(functools.partial(basic_block_forward, stride=stride2))
    out2 = fwd2(x2, params2)
    jax.block_until_ready(out2)
    assert out2.shape == (2, planes2, 16, 16), out2.shape
    assert bool(jnp.all(out2 >= 0.0))
    assert bool(jnp.all(jnp.isfinite(out2)))
    ref2 = _reference_forward(x2, params2, stride=stride2)
    assert bool(jnp.allclose(out2, ref2, atol=1e-1, rtol=1e-1)), \
        float(jnp.max(jnp.abs(out2 - ref2)))

    print("KERNEL_OK")
</pallas_src>

<mosaic_0001>
module attributes {stable_mosaic.version = 11 : i64} {
  func.func @kernel(%arg0: i32, %arg1: memref<1x9x9x128xbf16, #tpu.memory_space<vmem>>, %arg2: memref<1x9x9x128xbf16, #tpu.memory_space<vmem>>, %arg3: memref<1x9x9x128xbf16, #tpu.memory_space<vmem>>, %arg4: memref<1x9x9x128xbf16, #tpu.memory_space<vmem>>, %arg5: memref<3x3x128x128xbf16, #tpu.memory_space<vmem>>, %arg6: memref<1x128xf32, #tpu.memory_space<vmem>>, %arg7: memref<3x3x128x128xbf16, #tpu.memory_space<vmem>>, %arg8: memref<1x128xf32, #tpu.memory_space<vmem>>, %arg9: memref<128x128xbf16, #tpu.memory_space<vmem>>, %arg10: memref<1x128xf32, #tpu.memory_space<vmem>>, %arg11: memref<1x8x8x128xbf16, #tpu.memory_space<vmem>>, %arg12: memref<10x10x128xbf16, #tpu.memory_space<vmem>>) attributes {dimension_semantics = [#tpu.dimension_semantics<parallel>], iteration_bounds = array<i64: 2>, scalar_prefetch = 0 : i64, scratch_operands = 1 : i64, tpu.core_type = #tpu.core_type<tc>, window_params = [{transform_indices = @transform_0, window_bounds = array<i64: 1, 9, 9, 128>}, {transform_indices = @transform_1, window_bounds = array<i64: 1, 9, 9, 128>}, {transform_indices = @transform_2, window_bounds = array<i64: 1, 9, 9, 128>}, {transform_indices = @transform_3, window_bounds = array<i64: 1, 9, 9, 128>}, {pipeline_mode = #tpu.pipeline_mode<synchronous>, transform_indices = @transform_4, window_bounds = array<i64: 3, 3, 128, 128>}, {pipeline_mode = #tpu.pipeline_mode<synchronous>, transform_indices = @transform_5, window_bounds = array<i64: 1, 128>}, {pipeline_mode = #tpu.pipeline_mode<synchronous>, transform_indices = @transform_6, window_bounds = array<i64: 3, 3, 128, 128>}, {pipeline_mode = #tpu.pipeline_mode<synchronous>, transform_indices = @transform_7, window_bounds = array<i64: 1, 128>}, {pipeline_mode = #tpu.pipeline_mode<synchronous>, transform_indices = @transform_8, window_bounds = array<i64: 128, 128>}, {pipeline_mode = #tpu.pipeline_mode<synchronous>, transform_indices = @transform_9, window_bounds = array<i64: 1, 128>}, {transform_indices = @transform_10, window_bounds = array<i64: 1, 8, 8, 128>}]} {
    %cst = arith.constant 0.000000e+00 : f32
    %0 = vector.broadcast %cst : f32 to vector<64x128xf32>
    %c0 = arith.constant 0 : index
    %c0_0 = arith.constant 0 : index
    %c0_1 = arith.constant 0 : index
    %c0_2 = arith.constant 0 : index
    %1 = vector.load %arg1[%c0, %c0_0, %c0_1, %c0_2] : memref<1x9x9x128xbf16, #tpu.memory_space<vmem>>, vector<1x8x8x128xbf16>
    %2 = vector.shape_cast %1 : vector<1x8x8x128xbf16> to vector<8x8x128xbf16>
    %3 = vector.shape_cast %2 : vector<8x8x128xbf16> to vector<64x128xbf16>
    %c0_3 = arith.constant 0 : index
    %c0_4 = arith.constant 0 : index
    %c0_5 = arith.constant 0 : index
    %c0_6 = arith.constant 0 : index
    %4 = vector.load %arg5[%c0_3, %c0_4, %c0_5, %c0_6] : memref<3x3x128x128xbf16, #tpu.memory_space<vmem>>, vector<1x1x128x128xbf16>
    %5 = vector.shape_cast %4 : vector<1x1x128x128xbf16> to vector<128x128xbf16>
    %cst_7 = arith.constant dense<0.000000e+00> : vector<64x128xf32>
    %6 = tpu.matmul %3, %5, %cst_7 {dimension_numbers = #tpu.dot_dimension_numbers<[1], [0], [0], [1], [0, 0, 1, 1], [], []>} : vector<64x128xbf16>, vector<128x128xbf16>, vector<64x128xf32> -> vector<64x128xf32>
    %7 = arith.addf %0, %6 : vector<64x128xf32>
    %c0_8 = arith.constant 0 : index
    %c0_9 = arith.constant 0 : index
    %c0_10 = arith.constant 0 : index
    %c0_11 = arith.constant 0 : index
    %8 = vector.load %arg2[%c0_8, %c0_9, %c0_10, %c0_11] : memref<1x9x9x128xbf16, #tpu.memory_space<vmem>>, vector<1x8x8x128xbf16>
    %9 = vector.shape_cast %8 : vector<1x8x8x128xbf16> to vector<8x8x128xbf16>
    %10 = vector.shape_cast %9 : vector<8x8x128xbf16> to vector<64x128xbf16>
    %c0_12 = arith.constant 0 : index
    %c1 = arith.constant 1 : index
    %c0_13 = arith.constant 0 : index
    %c0_14 = arith.constant 0 : index
    %11 = vector.load %arg5[%c0_12, %c1, %c0_13, %c0_14] : memref<3x3x128x128xbf16, #tpu.memory_space<vmem>>, vector<1x1x128x128xbf16>
    %12 = vector.shape_cast %11 : vector<1x1x128x128xbf16> to vector<128x128xbf16>
    %cst_15 = arith.constant dense<0.000000e+00> : vector<64x128xf32>
    %13 = tpu.matmul %10, %12, %cst_15 {dimension_numbers = #tpu.dot_dimension_numbers<[1], [0], [0], [1], [0, 0, 1, 1], [], []>} : vector<64x128xbf16>, vector<128x128xbf16>, vector<64x128xf32> -> vector<64x128xf32>
    %14 = arith.addf %7, %13 : vector<64x128xf32>
    %c0_16 = arith.constant 0 : index
    %c0_17 = arith.constant 0 : index
    %c1_18 = arith.constant 1 : index
    %c0_19 = arith.constant 0 : index
    %15 = vector.load %arg1[%c0_16, %c0_17, %c1_18, %c0_19] : memref<1x9x9x128xbf16, #tpu.memory_space<vmem>>, vector<1x8x8x128xbf16>
    %16 = vector.shape_cast %15 : vector<1x8x8x128xbf16> to vector<8x8x128xbf16>
    %17 = vector.shape_cast %16 : vector<8x8x128xbf16> to vector<64x128xbf16>
    %c0_20 = arith.constant 0 : index
    %c2 = arith.constant 2 : index
    %c0_21 = arith.constant 0 : index
    %c0_22 = arith.constant 0 : index
    %18 = vector.load %arg5[%c0_20, %c2, %c0_21, %c0_22] : memref<3x3x128x128xbf16, #tpu.memory_space<vmem>>, vector<1x1x128x128xbf16>
    %19 = vector.shape_cast %18 : vector<1x1x128x128xbf16> to vector<128x128xbf16>
    %cst_23 = arith.constant dense<0.000000e+00> : vector<64x128xf32>
    %20 = tpu.matmul %17, %19, %cst_23 {dimension_numbers = #tpu.dot_dimension_numbers<[1], [0], [0], [1], [0, 0, 1, 1], [], []>} : vector<64x128xbf16>, vector<128x128xbf16>, vector<64x128xf32> -> vector<64x128xf32>
    %21 = arith.addf %14, %20 : vector<64x128xf32>
    %c0_24 = arith.constant 0 : index
    %c0_25 = arith.constant 0 : index
    %c0_26 = arith.constant 0 : index
    %c0_27 = arith.constant 0 : index
    %22 = vector.load %arg3[%c0_24, %c0_25, %c0_26, %c0_27] : memref<1x9x9x128xbf16, #tpu.memory_space<vmem>>, vector<1x8x8x128xbf16>
    %23 = vector.shape_cast %22 : vector<1x8x8x128xbf16> to vector<8x8x128xbf16>
    %24 = vector.shape_cast %23 : vector<8x8x128xbf16> to vector<64x128xbf16>
    %c1_28 = arith.constant 1 : index
    %c0_29 = arith.constant 0 : index
    %c0_30 = arith.constant 0 : index
    %c0_31 = arith.constant 0 : index
    %25 = vector.load %arg5[%c1_28, %c0_29, %c0_30, %c0_31] : memref<3x3x128x128xbf16, #tpu.memory_space<vmem>>, vector<1x1x128x128xbf16>
    %26 = vector.shape_cast %25 : vector<1x1x128x128xbf16> to vector<128x128xbf16>
    %cst_32 = arith.constant dense<0.000000e+00> : vector<64x128xf32>
    %27 = tpu.matmul %24, %26, %cst_32 {dimension_numbers = #tpu.dot_dimension_numbers<[1], [0], [0], [1], [0, 0, 1, 1], [], []>} : vector<64x128xbf16>, vector<128x128xbf16>, vector<64x128xf32> -> vector<64x128xf32>
    %28 = arith.addf %21, %27 : vector<64x128xf32>
    %c0_33 = arith.constant 0 : index
    %c0_34 = arith.constant 0 : index
    %c0_35 = arith.constant 0 : index
    %c0_36 = arith.constant 0 : index
    %29 = vector.load %arg4[%c0_33, %c0_34, %c0_35, %c0_36] : memref<1x9x9x128xbf16, #tpu.memory_space<vmem>>, vector<1x8x8x128xbf16>
    %30 = vector.shape_cast %29 : vector<1x8x8x128xbf16> to vector<8x8x128xbf16>
    %31 = vector.shape_cast %30 : vector<8x8x128xbf16> to vector<64x128xbf16>
    %c1_37 = arith.constant 1 : index
    %c1_38 = arith.constant 1 : index
    %c0_39 = arith.constant 0 : index
    %c0_40 = arith.constant 0 : index
    %32 = vector.load %arg5[%c1_37, %c1_38, %c0_39, %c0_40] : memref<3x3x128x128xbf16, #tpu.memory_space<vmem>>, vector<1x1x128x128xbf16>
    %33 = vector.shape_cast %32 : vector<1x1x128x128xbf16> to vector<128x128xbf16>
    %cst_41 = arith.constant dense<0.000000e+00> : vector<64x128xf32>
    %34 = tpu.matmul %31, %33, %cst_41 {dimension_numbers = #tpu.dot_dimension_numbers<[1], [0], [0], [1], [0, 0, 1, 1], [], []>} : vector<64x128xbf16>, vector<128x128xbf16>, vector<64x128xf32> -> vector<64x128xf32>
    %35 = arith.addf %28, %34 : vector<64x128xf32>
    %c0_42 = arith.constant 0 : index
    %c0_43 = arith.constant 0 : index
    %c1_44 = arith.constant 1 : index
    %c0_45 = arith.constant 0 : index
    %36 = vector.load %arg3[%c0_42, %c0_43, %c1_44, %c0_45] : memref<1x9x9x128xbf16, #tpu.memory_space<vmem>>, vector<1x8x8x128xbf16>
    %37 = vector.shape_cast %36 : vector<1x8x8x128xbf16> to vector<8x8x128xbf16>
    %38 = vector.shape_cast %37 : vector<8x8x128xbf16> to vector<64x128xbf16>
    %c1_46 = arith.constant 1 : index
    %c2_47 = arith.constant 2 : index
    %c0_48 = arith.constant 0 : index
    %c0_49 = arith.constant 0 : index
    %39 = vector.load %arg5[%c1_46, %c2_47, %c0_48, %c0_49] : memref<3x3x128x128xbf16, #tpu.memory_space<vmem>>, vector<1x1x128x128xbf16>
    %40 = vector.shape_cast %39 : vector<1x1x128x128xbf16> to vector<128x128xbf16>
    %cst_50 = arith.constant dense<0.000000e+00> : vector<64x128xf32>
    %41 = tpu.matmul %38, %40, %cst_50 {dimension_numbers = #tpu.dot_dimension_numbers<[1], [0], [0], [1], [0, 0, 1, 1], [], []>} : vector<64x128xbf16>, vector<128x128xbf16>, vector<64x128xf32> -> vector<64x128xf32>
    %42 = arith.addf %35, %41 : vector<64x128xf32>
    %c0_51 = arith.constant 0 : index
    %c1_52 = arith.constant 1 : index
    %c0_53 = arith.constant 0 : index
    %c0_54 = arith.constant 0 : index
    %43 = vector.load %arg1[%c0_51, %c1_52, %c0_53, %c0_54] : memref<1x9x9x128xbf16, #tpu.memory_space<vmem>>, vector<1x8x8x128xbf16>
    %44 = vector.shape_cast %43 : vector<1x8x8x128xbf16> to vector<8x8x128xbf16>
    %45 = vector.shape_cast %44 : vector<8x8x128xbf16> to vector<64x128xbf16>
    %c2_55 = arith.constant 2 : index
    %c0_56 = arith.constant 0 : index
    %c0_57 = arith.constant 0 : index
    %c0_58 = arith.constant 0 : index
    %46 = vector.load %arg5[%c2_55, %c0_56, %c0_57, %c0_58] : memref<3x3x128x128xbf16, #tpu.memory_space<vmem>>, vector<1x1x128x128xbf16>
    %47 = vector.shape_cast %46 : vector<1x1x128x128xbf16> to vector<128x128xbf16>
    %cst_59 = arith.constant dense<0.000000e+00> : vector<64x128xf32>
    %48 = tpu.matmul %45, %47, %cst_59 {dimension_numbers = #tpu.dot_dimension_numbers<[1], [0], [0], [1], [0, 0, 1, 1], [], []>} : vector<64x128xbf16>, vector<128x128xbf16>, vector<64x128xf32> -> vector<64x128xf32>
    %49 = arith.addf %42, %48 : vector<64x128xf32>
    %c0_60 = arith.constant 0 : index
    %c1_61 = arith.constant 1 : index
    %c0_62 = arith.constant 0 : index
    %c0_63 = arith.constant 0 : index
    %50 = vector.load %arg2[%c0_60, %c1_61, %c0_62, %c0_63] : memref<1x9x9x128xbf16, #tpu.memory_space<vmem>>, vector<1x8x8x128xbf16>
    %51 = vector.shape_cast %50 : vector<1x8x8x128xbf16> to vector<8x8x128xbf16>
    %52 = vector.shape_cast %51 : vector<8x8x128xbf16> to vector<64x128xbf16>
    %c2_64 = arith.constant 2 : index
    %c1_65 = arith.constant 1 : index
    %c0_66 = arith.constant 0 : index
    %c0_67 = arith.constant 0 : index
    %53 = vector.load %arg5[%c2_64, %c1_65, %c0_66, %c0_67] : memref<3x3x128x128xbf16, #tpu.memory_space<vmem>>, vector<1x1x128x128xbf16>
    %54 = vector.shape_cast %53 : vector<1x1x128x128xbf16> to vector<128x128xbf16>
    %cst_68 = arith.constant dense<0.000000e+00> : vector<64x128xf32>
    %55 = tpu.matmul %52, %54, %cst_68 {dimension_numbers = #tpu.dot_dimension_numbers<[1], [0], [0], [1], [0, 0, 1, 1], [], []>} : vector<64x128xbf16>, vector<128x128xbf16>, vector<64x128xf32> -> vector<64x128xf32>
    %56 = arith.addf %49, %55 : vector<64x128xf32>
    %c0_69 = arith.constant 0 : index
    %c1_70 = arith.constant 1 : index
    %c1_71 = arith.constant 1 : index
    %c0_72 = arith.constant 0 : index
    %57 = vector.load %arg1[%c0_69, %c1_70, %c1_71, %c0_72] : memref<1x9x9x128xbf16, #tpu.memory_space<vmem>>, vector<1x8x8x128xbf16>
    %58 = vector.shape_cast %57 : vector<1x8x8x128xbf16> to vector<8x8x128xbf16>
    %59 = vector.shape_cast %58 : vector<8x8x128xbf16> to vector<64x128xbf16>
    %c2_73 = arith.constant 2 : index
    %c2_74 = arith.constant 2 : index
    %c0_75 = arith.constant 0 : index
    %c0_76 = arith.constant 0 : index
    %60 = vector.load %arg5[%c2_73, %c2_74, %c0_75, %c0_76] : memref<3x3x128x128xbf16, #tpu.memory_space<vmem>>, vector<1x1x128x128xbf16>
    %61 = vector.shape_cast %60 : vector<1x1x128x128xbf16> to vector<128x128xbf16>
    %cst_77 = arith.constant dense<0.000000e+00> : vector<64x128xf32>
    %62 = tpu.matmul %59, %61, %cst_77 {dimension_numbers = #tpu.dot_dimension_numbers<[1], [0], [0], [1], [0, 0, 1, 1], [], []>} : vector<64x128xbf16>, vector<128x128xbf16>, vector<64x128xf32> -> vector<64x128xf32>
    %63 = arith.addf %56, %62 : vector<64x128xf32>
    %c0_78 = arith.constant 0 : index
    %c0_79 = arith.constant 0 : index
    %64 = vector.load %arg6[%c0_78, %c0_79] : memref<1x128xf32, #tpu.memory_space<vmem>>, vector<1x128xf32>
    %65 = vector.broadcast %64 : vector<1x128xf32> to vector<64x128xf32>
    %66 = arith.addf %63, %65 : vector<64x128xf32>
    %cst_80 = arith.constant 0.000000e+00 : f32
    %67 = vector.broadcast %cst_80 : f32 to vector<64x128xf32>
    %68 = arith.maximumf %66, %67 : vector<64x128xf32>
    %69 = arith.truncf %68 : vector<64x128xf32> to vector<64x128xbf16>
    %cst_81 = arith.constant 0.000000e+00 : bf16
    %70 = vector.broadcast %cst_81 : bf16 to vector<10x10x128xbf16>
    %c0_82 = arith.constant 0 : index
    %c0_83 = arith.constant 0 : index
    %c0_84 = arith.constant 0 : index
    %71 = vector.load %arg12[%c0_82, %c0_83, %c0_84] : memref<10x10x128xbf16, #tpu.memory_space<vmem>>, vector<10x10x128xbf16>
    tpu.vector_store %arg12[%c0_82, %c0_83, %c0_84], %70 {strides = array<i32>} : memref<10x10x128xbf16, #tpu.memory_space<vmem>>, vector<10x10x128xbf16>,
    %72 = vector.shape_cast %69 : vector<64x128xbf16> to vector<8x8x128xbf16>
    %c1_85 = arith.constant 1 : index
    %c1_86 = arith.constant 1 : index
    %c0_87 = arith.constant 0 : index
    %73 = vector.load %arg12[%c1_85, %c1_86, %c0_87] : memref<10x10x128xbf16, #tpu.memory_space<vmem>>, vector<8x8x128xbf16>
    tpu.vector_store %arg12[%c1_85, %c1_86, %c0_87], %72 {strides = array<i32>} : memref<10x10x128xbf16, #tpu.memory_space<vmem>>, vector<8x8x128xbf16>,
    %cst_88 = arith.constant 0.000000e+00 : f32
    %74 = vector.broadcast %cst_88 : f32 to vector<64x128xf32>
    %c0_89 = arith.constant 0 : index
    %c0_90 = arith.constant 0 : index
    %c0_91 = arith.constant 0 : index
    %75 = vector.load %arg12[%c0_89, %c0_90, %c0_91] : memref<10x10x128xbf16, #tpu.memory_space<vmem>>, vector<8x8x128xbf16>
    %76 = vector.shape_cast %75 : vector<8x8x128xbf16> to vector<64x128xbf16>
    %c0_92 = arith.constant 0 : index
    %c0_93 = arith.constant 0 : index
    %c0_94 = arith.constant 0 : index
    %c0_95 = arith.constant 0 : index
    %77 = vector.load %arg7[%c0_92, %c0_93, %c0_94, %c0_95] : memref<3x3x128x128xbf16, #tpu.memory_space<vmem>>, vector<1x1x128x128xbf16>
    %78 = vector.shape_cast %77 : vector<1x1x128x128xbf16> to vector<128x128xbf16>
    %cst_96 = arith.constant dense<0.000000e+00> : vector<64x128xf32>
    %79 = tpu.matmul %76, %78, %cst_96 {dimension_numbers = #tpu.dot_dimension_numbers<[1], [0], [0], [1], [0, 0, 1, 1], [], []>} : vector<64x128xbf16>, vector<128x128xbf16>, vector<64x128xf32> -> vector<64x128xf32>
    %80 = arith.addf %74, %79 : vector<64x128xf32>
    %c0_97 = arith.constant 0 : index
    %c1_98 = arith.constant 1 : index
    %c0_99 = arith.constant 0 : index
    %81 = vector.load %arg12[%c0_97, %c1_98, %c0_99] : memref<10x10x128xbf16, #tpu.memory_space<vmem>>, vector<8x8x128xbf16>
    %82 = vector.shape_cast %81 : vector<8x8x128xbf16> to vector<64x128xbf16>
    %c0_100 = arith.constant 0 : index
    %c1_101 = arith.constant 1 : index
    %c0_102 = arith.constant 0 : index
    %c0_103 = arith.constant 0 : index
    %83 = vector.load %arg7[%c0_100, %c1_101, %c0_102, %c0_103] : memref<3x3x128x128xbf16, #tpu.memory_space<vmem>>, vector<1x1x128x128xbf16>
    %84 = vector.shape_cast %83 : vector<1x1x128x128xbf16> to vector<128x128xbf16>
    %cst_104 = arith.constant dense<0.000000e+00> : vector<64x128xf32>
    %85 = tpu.matmul %82, %84, %cst_104 {dimension_numbers = #tpu.dot_dimension_numbers<[1], [0], [0], [1], [0, 0, 1, 1], [], []>} : vector<64x128xbf16>, vector<128x128xbf16>, vector<64x128xf32> -> vector<64x128xf32>
    %86 = arith.addf %80, %85 : vector<64x128xf32>
    %c0_105 = arith.constant 0 : index
    %c2_106 = arith.constant 2 : index
    %c0_107 = arith.constant 0 : index
    %87 = vector.load %arg12[%c0_105, %c2_106, %c0_107] : memref<10x10x128xbf16, #tpu.memory_space<vmem>>, vector<8x8x128xbf16>
    %88 = vector.shape_cast %87 : vector<8x8x128xbf16> to vector<64x128xbf16>
    %c0_108 = arith.constant 0 : index
    %c2_109 = arith.constant 2 : index
    %c0_110 = arith.constant 0 : index
    %c0_111 = arith.constant 0 : index
    %89 = vector.load %arg7[%c0_108, %c2_109, %c0_110, %c0_111] : memref<3x3x128x128xbf16, #tpu.memory_space<vmem>>, vector<1x1x128x128xbf16>
    %90 = vector.shape_cast %89 : vector<1x1x128x128xbf16> to vector<128x128xbf16>
    %cst_112 = arith.constant dense<0.000000e+00> : vector<64x128xf32>
    %91 = tpu.matmul %88, %90, %cst_112 {dimension_numbers = #tpu.dot_dimension_numbers<[1], [0], [0], [1], [0, 0, 1, 1], [], []>} : vector<64x128xbf16>, vector<128x128xbf16>, vector<64x128xf32> -> vector<64x128xf32>
    %92 = arith.addf %86, %91 : vector<64x128xf32>
    %c1_113 = arith.constant 1 : index
    %c0_114 = arith.constant 0 : index
    %c0_115 = arith.constant 0 : index
    %93 = vector.load %arg12[%c1_113, %c0_114, %c0_115] : memref<10x10x128xbf16, #tpu.memory_space<vmem>>, vector<8x8x128xbf16>
    %94 = vector.shape_cast %93 : vector<8x8x128xbf16> to vector<64x128xbf16>
    %c1_116 = arith.constant 1 : index
    %c0_117 = arith.constant 0 : index
    %c0_118 = arith.constant 0 : index
    %c0_119 = arith.constant 0 : index
    %95 = vector.load %arg7[%c1_116, %c0_117, %c0_118, %c0_119] : memref<3x3x128x128xbf16, #tpu.memory_space<vmem>>, vector<1x1x128x128xbf16>
    %96 = vector.shape_cast %95 : vector<1x1x128x128xbf16> to vector<128x128xbf16>
    %cst_120 = arith.constant dense<0.000000e+00> : vector<64x128xf32>
    %97 = tpu.matmul %94, %96, %cst_120 {dimension_numbers = #tpu.dot_dimension_numbers<[1], [0], [0], [1], [0, 0, 1, 1], [], []>} : vector<64x128xbf16>, vector<128x128xbf16>, vector<64x128xf32> -> vector<64x128xf32>
    %98 = arith.addf %92, %97 : vector<64x128xf32>
    %c1_121 = arith.constant 1 : index
    %c1_122 = arith.constant 1 : index
    %c0_123 = arith.constant 0 : index
    %99 = vector.load %arg12[%c1_121, %c1_122, %c0_123] : memref<10x10x128xbf16, #tpu.memory_space<vmem>>, vector<8x8x128xbf16>
    %100 = vector.shape_cast %99 : vector<8x8x128xbf16> to vector<64x128xbf16>
    %c1_124 = arith.constant 1 : index
    %c1_125 = arith.constant 1 : index
    %c0_126 = arith.constant 0 : index
    %c0_127 = arith.constant 0 : index
    %101 = vector.load %arg7[%c1_124, %c1_125, %c0_126, %c0_127] : memref<3x3x128x128xbf16, #tpu.memory_space<vmem>>, vector<1x1x128x128xbf16>
    %102 = vector.shape_cast %101 : vector<1x1x128x128xbf16> to vector<128x128xbf16>
    %cst_128 = arith.constant dense<0.000000e+00> : vector<64x128xf32>
    %103 = tpu.matmul %100, %102, %cst_128 {dimension_numbers = #tpu.dot_dimension_numbers<[1], [0], [0], [1], [0, 0, 1, 1], [], []>} : vector<64x128xbf16>, vector<128x128xbf16>, vector<64x128xf32> -> vector<64x128xf32>
    %104 = arith.addf %98, %103 : vector<64x128xf32>
    %c1_129 = arith.constant 1 : index
    %c2_130 = arith.constant 2 : index
    %c0_131 = arith.constant 0 : index
    %105 = vector.load %arg12[%c1_129, %c2_130, %c0_131] : memref<10x10x128xbf16, #tpu.memory_space<vmem>>, vector<8x8x128xbf16>
    %106 = vector.shape_cast %105 : vector<8x8x128xbf16> to vector<64x128xbf16>
    %c1_132 = arith.constant 1 : index
    %c2_133 = arith.constant 2 : index
    %c0_134 = arith.constant 0 : index
    %c0_135 = arith.constant 0 : index
    %107 = vector.load %arg7[%c1_132, %c2_133, %c0_134, %c0_135] : memref<3x3x128x128xbf16, #tpu.memory_space<vmem>>, vector<1x1x128x128xbf16>
    %108 = vector.shape_cast %107 : vector<1x1x128x128xbf16> to vector<128x128xbf16>
    %cst_136 = arith.constant dense<0.000000e+00> : vector<64x128xf32>
    %109 = tpu.matmul %106, %108, %cst_136 {dimension_numbers = #tpu.dot_dimension_numbers<[1], [0], [0], [1], [0, 0, 1, 1], [], []>} : vector<64x128xbf16>, vector<128x128xbf16>, vector<64x128xf32> -> vector<64x128xf32>
    %110 = arith.addf %104, %109 : vector<64x128xf32>
    %c2_137 = arith.constant 2 : index
    %c0_138 = arith.constant 0 : index
    %c0_139 = arith.constant 0 : index
    %111 = vector.load %arg12[%c2_137, %c0_138, %c0_139] : memref<10x10x128xbf16, #tpu.memory_space<vmem>>, vector<8x8x128xbf16>
    %112 = vector.shape_cast %111 : vector<8x8x128xbf16> to vector<64x128xbf16>
    %c2_140 = arith.constant 2 : index
    %c0_141 = arith.constant 0 : index
    %c0_142 = arith.constant 0 : index
    %c0_143 = arith.constant 0 : index
    %113 = vector.load %arg7[%c2_140, %c0_141, %c0_142, %c0_143] : memref<3x3x128x128xbf16, #tpu.memory_space<vmem>>, vector<1x1x128x128xbf16>
    %114 = vector.shape_cast %113 : vector<1x1x128x128xbf16> to vector<128x128xbf16>
    %cst_144 = arith.constant dense<0.000000e+00> : vector<64x128xf32>
    %115 = tpu.matmul %112, %114, %cst_144 {dimension_numbers = #tpu.dot_dimension_numbers<[1], [0], [0], [1], [0, 0, 1, 1], [], []>} : vector<64x128xbf16>, vector<128x128xbf16>, vector<64x128xf32> -> vector<64x128xf32>
    %116 = arith.addf %110, %115 : vector<64x128xf32>
    %c2_145 = arith.constant 2 : index
    %c1_146 = arith.constant 1 : index
    %c0_147 = arith.constant 0 : index
    %117 = vector.load %arg12[%c2_145, %c1_146, %c0_147] : memref<10x10x128xbf16, #tpu.memory_space<vmem>>, vector<8x8x128xbf16>
    %118 = vector.shape_cast %117 : vector<8x8x128xbf16> to vector<64x128xbf16>
    %c2_148 = arith.constant 2 : index
    %c1_149 = arith.constant 1 : index
    %c0_150 = arith.constant 0 : index
    %c0_151 = arith.constant 0 : index
    %119 = vector.load %arg7[%c2_148, %c1_149, %c0_150, %c0_151] : memref<3x3x128x128xbf16, #tpu.memory_space<vmem>>, vector<1x1x128x128xbf16>
    %120 = vector.shape_cast %119 : vector<1x1x128x128xbf16> to vector<128x128xbf16>
    %cst_152 = arith.constant dense<0.000000e+00> : vector<64x128xf32>
    %121 = tpu.matmul %118, %120, %cst_152 {dimension_numbers = #tpu.dot_dimension_numbers<[1], [0], [0], [1], [0, 0, 1, 1], [], []>} : vector<64x128xbf16>, vector<128x128xbf16>, vector<64x128xf32> -> vector<64x128xf32>
    %122 = arith.addf %116, %121 : vector<64x128xf32>
    %c2_153 = arith.constant 2 : index
    %c2_154 = arith.constant 2 : index
    %c0_155 = arith.constant 0 : index
    %123 = vector.load %arg12[%c2_153, %c2_154, %c0_155] : memref<10x10x128xbf16, #tpu.memory_space<vmem>>, vector<8x8x128xbf16>
    %124 = vector.shape_cast %123 : vector<8x8x128xbf16> to vector<64x128xbf16>
    %c2_156 = arith.constant 2 : index
    %c2_157 = arith.constant 2 : index
    %c0_158 = arith.constant 0 : index
    %c0_159 = arith.constant 0 : index
    %125 = vector.load %arg7[%c2_156, %c2_157, %c0_158, %c0_159] : memref<3x3x128x128xbf16, #tpu.memory_space<vmem>>, vector<1x1x128x128xbf16>
    %126 = vector.shape_cast %125 : vector<1x1x128x128xbf16> to vector<128x128xbf16>
    %cst_160 = arith.constant dense<0.000000e+00> : vector<64x128xf32>
    %127 = tpu.matmul %124, %126, %cst_160 {dimension_numbers = #tpu.dot_dimension_numbers<[1], [0], [0], [1], [0, 0, 1, 1], [], []>} : vector<64x128xbf16>, vector<128x128xbf16>, vector<64x128xf32> -> vector<64x128xf32>
    %128 = arith.addf %122, %127 : vector<64x128xf32>
    %c0_161 = arith.constant 0 : index
    %c0_162 = arith.constant 0 : index
    %129 = vector.load %arg8[%c0_161, %c0_162] : memref<1x128xf32, #tpu.memory_space<vmem>>, vector<1x128xf32>
    %130 = vector.broadcast %129 : vector<1x128xf32> to vector<64x128xf32>
    %131 = arith.addf %128, %130 : vector<64x128xf32>
    %c0_163 = arith.constant 0 : index
    %c0_164 = arith.constant 0 : index
    %c0_165 = arith.constant 0 : index
    %c0_166 = arith.constant 0 : index
    %132 = vector.load %arg4[%c0_163, %c0_164, %c0_165, %c0_166] : memref<1x9x9x128xbf16, #tpu.memory_space<vmem>>, vector<1x8x8x128xbf16>
    %133 = vector.shape_cast %132 : vector<1x8x8x128xbf16> to vector<8x8x128xbf16>
    %134 = vector.shape_cast %133 : vector<8x8x128xbf16> to vector<64x128xbf16>
    %c0_167 = arith.constant 0 : index
    %c0_168 = arith.constant 0 : index
    %135 = vector.load %arg9[%c0_167, %c0_168] : memref<128x128xbf16, #tpu.memory_space<vmem>>, vector<128x128xbf16>
    %cst_169 = arith.constant dense<0.000000e+00> : vector<64x128xf32>
    %136 = tpu.matmul %134, %135, %cst_169 {dimension_numbers = #tpu.dot_dimension_numbers<[1], [0], [0], [1], [0, 0, 1, 1], [], []>} : vector<64x128xbf16>, vector<128x128xbf16>, vector<64x128xf32> -> vector<64x128xf32>
    %137 = arith.addf %131, %136 : vector<64x128xf32>
    %c0_170 = arith.constant 0 : index
    %c0_171 = arith.constant 0 : index
    %138 = vector.load %arg10[%c0_170, %c0_171] : memref<1x128xf32, #tpu.memory_space<vmem>>, vector<1x128xf32>
    %139 = vector.broadcast %138 : vector<1x128xf32> to vector<64x128xf32>
    %140 = arith.addf %137, %139 : vector<64x128xf32>
    %cst_172 = arith.constant 0.000000e+00 : f32
    %141 = vector.broadcast %cst_172 : f32 to vector<64x128xf32>
    %142 = arith.maximumf %140, %141 : vector<64x128xf32>
    %143 = vector.shape_cast %142 : vector<64x128xf32> to vector<8x8x128xf32>
    %144 = arith.truncf %143 : vector<8x8x128xf32> to vector<8x8x128xbf16>
    %c0_173 = arith.constant 0 : index
    %c0_174 = arith.constant 0 : index
    %c0_175 = arith.constant 0 : index
    %c0_176 = arith.constant 0 : index
    %145 = vector.load %arg11[%c0_173, %c0_174, %c0_175, %c0_176] : memref<1x8x8x128xbf16, #tpu.memory_space<vmem>>, vector<1x8x8x128xbf16>
    %146 = vector.shape_cast %145 : vector<1x8x8x128xbf16> to vector<8x8x128xbf16>
    %147 = vector.shape_cast %144 : vector<8x8x128xbf16> to vector<1x8x8x128xbf16>
    tpu.vector_store %arg11[%c0_173, %c0_174, %c0_175, %c0_176], %147 {strides = array<i32>} : memref<1x8x8x128xbf16, #tpu.memory_space<vmem>>, vector<1x8x8x128xbf16>,
    return
  }
  func.func @transform_0(%arg0: i32) -> (i32, i32, i32, i32) {
    %c0_i32 = arith.constant 0 : i32
    %c0_i32_0 = arith.constant 0 : i32
    %c0_i32_1 = arith.constant 0 : i32
    %c0_i32_2 = arith.constant 0 : i32
    return %arg0, %c0_i32, %c0_i32_0, %c0_i32_1 : i32, i32, i32, i32
  }
  func.func @transform_1(%arg0: i32) -> (i32, i32, i32, i32) {
    %c0_i32 = arith.constant 0 : i32
    %c0_i32_0 = arith.constant 0 : i32
    %c0_i32_1 = arith.constant 0 : i32
    %c0_i32_2 = arith.constant 0 : i32
    return %arg0, %c0_i32, %c0_i32_0, %c0_i32_1 : i32, i32, i32, i32
  }
  func.func @transform_2(%arg0: i32) -> (i32, i32, i32, i32) {
    %c0_i32 = arith.constant 0 : i32
    %c0_i32_0 = arith.constant 0 : i32
    %c0_i32_1 = arith.constant 0 : i32
    %c0_i32_2 = arith.constant 0 : i32
    return %arg0, %c0_i32, %c0_i32_0, %c0_i32_1 : i32, i32, i32, i32
  }
  func.func @transform_3(%arg0: i32) -> (i32, i32, i32, i32) {
    %c0_i32 = arith.constant 0 : i32
    %c0_i32_0 = arith.constant 0 : i32
    %c0_i32_1 = arith.constant 0 : i32
    %c0_i32_2 = arith.constant 0 : i32
    return %arg0, %c0_i32, %c0_i32_0, %c0_i32_1 : i32, i32, i32, i32
  }
  func.func @transform_4(%arg0: i32) -> (i32, i32, i32, i32) {
    %c0_i32 = arith.constant 0 : i32
    %c0_i32_0 = arith.constant 0 : i32
    %c0_i32_1 = arith.constant 0 : i32
    %c0_i32_2 = arith.constant 0 : i32
    %c0_i32_3 = arith.constant 0 : i32
    return %c0_i32, %c0_i32_0, %c0_i32_1, %c0_i32_2 : i32, i32, i32, i32
  }
  func.func @transform_5(%arg0: i32) -> (i32, i32) {
    %c0_i32 = arith.constant 0 : i32
    %c0_i32_0 = arith.constant 0 : i32
    %c0_i32_1 = arith.constant 0 : i32
    return %c0_i32, %c0_i32_0 : i32, i32
  }
  func.func @transform_6(%arg0: i32) -> (i32, i32, i32, i32) {
    %c0_i32 = arith.constant 0 : i32
    %c0_i32_0 = arith.constant 0 : i32
    %c0_i32_1 = arith.constant 0 : i32
    %c0_i32_2 = arith.constant 0 : i32
    %c0_i32_3 = arith.constant 0 : i32
    return %c0_i32, %c0_i32_0, %c0_i32_1, %c0_i32_2 : i32, i32, i32, i32
  }
  func.func @transform_7(%arg0: i32) -> (i32, i32) {
    %c0_i32 = arith.constant 0 : i32
    %c0_i32_0 = arith.constant 0 : i32
    %c0_i32_1 = arith.constant 0 : i32
    return %c0_i32, %c0_i32_0 : i32, i32
  }
  func.func @transform_8(%arg0: i32) -> (i32, i32) {
    %c0_i32 = arith.constant 0 : i32
    %c0_i32_0 = arith.constant 0 : i32
    %c0_i32_1 = arith.constant 0 : i32
    return %c0_i32, %c0_i32_0 : i32, i32
  }
  func.func @transform_9(%arg0: i32) -> (i32, i32) {
    %c0_i32 = arith.constant 0 : i32
    %c0_i32_0 = arith.constant 0 : i32
    %c0_i32_1 = arith.constant 0 : i32
    return %c0_i32, %c0_i32_0 : i32, i32
  }
  func.func @transform_10(%arg0: i32) -> (i32, i32, i32, i32) {
    %c0_i32 = arith.constant 0 : i32
    %c0_i32_0 = arith.constant 0 : i32
    %c0_i32_1 = arith.constant 0 : i32
    %c0_i32_2 = arith.constant 0 : i32
    return %arg0, %c0_i32, %c0_i32_0, %c0_i32_1 : i32, i32, i32, i32
  }
}

</mosaic_0001>

<bundles_post_ra>
// kernel: basic_block_forward.1
= control target key start
LH: loop header
LB: loop body
LE: loop exit
PB: predicated region body
PF: predicated region fallthrough
CT: control target
= control target key end

     0   :  { %s6462_s13 = smov 0   ;;  %s7465_s0 = inlined_call_operand.vmem [shape: bf16[2,9,9,128], index: 0, kind: input, shape index: {}]   ;;  %s7466_s1 = inlined_call_operand.vmem [shape: bf16[2,9,9,128], index: 1, kind: input, shape index: {}]   ;;  %s7467_s2 = inlined_call_operand.vmem [shape: bf16[2,9,9,128], index: 2, kind: input, shape index: {}]   ;;  %s7468_s3 = inlined_call_operand.vmem [shape: bf16[2,9,9,128], index: 3, kind: input, shape index: {}]   ;;  %s7469_s4 = inlined_call_operand.vmem [shape: bf16[3,3,128,128], index: 4, kind: input, shape index: {}]   ;;  %s7470_s5 = inlined_call_operand.vmem [shape: f32[1,128], index: 5, kind: input, shape index: {}]   ;;  %s7471_s6 = inlined_call_operand.vmem [shape: bf16[3,3,128,128], index: 6, kind: input, shape index: {}]   ;;  %s7472_s7 = inlined_call_operand.vmem [shape: f32[1,128], index: 7, kind: input, shape index: {}]   ;;  %s7473_s8 = inlined_call_operand.vmem [shape: bf16[128,128], index: 8, kind: input, shape index: {}]   ;;  %s7474_s9 = inlined_call_operand.vmem [shape: f32[1,128], index: 9, kind: input, shape index: {}]   ;;  %s7475_s10 = inlined_call_operand.vmem [shape: bf16[2,8,8,128], index: 10, kind: output, shape index: {}]  }
   0x1 LB: > { %s4756_s14 = sadd.s32 4294967295, %s6404_s13   ;;  %p4760_p0 = scmp.ge.s32.totalorder %s6404_s13, 1  ;;  %s6404_s13 = sphi %s6462_s13, %s20_s13  }
   0x2   : > { %p342_p1 = scmp.lt.s32.totalorder %s6404_s13, 3 }
   0x4   : > { %p343_p2 = pnand %p4760_p0, %p342_p1 }
   0x5   : > { %v6206_v0 = vld [vmem:[%s7469_s4 + $0x40] sm:$0xff] (!%p343_p2)   ;;  %p395_p3 = scmp.lt.s32.totalorder (!%p343_p2), %s4756_s14, 1  ;;  %v6207_v1 = vld [vmem:[%s7469_s4 + $0x48] sm:$0xff] (!%p343_p2)   ;;  %v6208_v2 = vld [vmem:[%s7469_s4 + $0x50] sm:$0xff] (!%p343_p2)   ;;  %vm760_vm0 = vsmask.f32 (!%p343_p2), 3328 }
   0x6   : > { %346 = sbr.rel (%p343_p2) target bundleno = 1059 (0x423), region = 60  ;;  %5580 = vmatprep.subr.bf16.mxu0 (!%p343_p2), %v6206_v0  ;;  %v6209_v3 = vld [vmem:[%s7469_s4 + $0x58] sm:$0xff] (!%p343_p2)   ;;  %v6210_v5 = vld [vmem:[%s7469_s4 + $0x60] sm:$0xff] (!%p343_p2)   ;;  %v6211_v6 = vld [vmem:[%s7469_s4 + $0x68] sm:$0xff] (!%p343_p2)   ;;  %vm761_vm1 = vsmask.f32 (!%p343_p2), 7440 }
   0x7   : > { %5581 = vmatpush3.bf16.msra.mxu0 (!%p343_p2), %v6206_v0  ;;  %v6212_v7 = vld [vmem:[%s7469_s4 + $0x70] sm:$0xff] (!%p343_p2)   ;;  %v6213_v8 = vld [vmem:[%s7469_s4 + $0x78] sm:$0xff] (!%p343_p2)   ;;  %v6215_v9 = vld [vmem:[%s7469_s4] sm:$0xff] (!%p343_p2)   ;;  %vm2423_vm3 = vcmask (!%p343_p2), 1043456   ;;  %vm2424_vm4 = vsmask.f32 (!%p343_p2), 7938 }
   0x8   : > { %5582 = vmatprep.subr.bf16.mxu0 (!%p343_p2), %v6207_v1  ;;  %v6217_v12 = vld [vmem:[%s7469_s4 + $0x8] sm:$0xff] (!%p343_p2)   ;;  %v6218_v13 = vld [vmem:[%s7469_s4 + $0x10] sm:$0xff] (!%p343_p2)   ;;  %v6219_v16 = vld [vmem:[%s7469_s4 + $0x18] sm:$0xff] (!%p343_p2)   ;;  %vm2429_vm5 = vcmask (!%p343_p2), 1040384   ;;  %vm2430_vm6 = vsmask.f32 (!%p343_p2), 256 }
   0x9   : > { %v6220_v17 = vld [vmem:[%s7469_s4 + $0x20] sm:$0xff] (!%p343_p2)   ;;  %v6221_v18 = vld [vmem:[%s7469_s4 + $0x28] sm:$0xff] (!%p343_p2)   ;;  %v6223_v23 = vld [vmem:[%s7469_s4 + $0x30] sm:$0xff] (!%p343_p2)   ;;  %vm2928_vm9 = vcmask (!%p343_p2), 1042432   ;;  %vm2929_vm10 = vcmask (!%p343_p2), 1046532  }
   0xa   : > { %v6225_v27 = vld [vmem:[%s7469_s4 + $0x38] sm:$0xff] (!%p343_p2)   ;;  %v6227_v33 = vld [vmem:[%s7469_s4 + $0x80] sm:$0xff] (!%p343_p2)   ;;  %v6229_v40 = vld [vmem:[%s7469_s4 + $0x88] sm:$0xff] (!%p343_p2)  }
   0xb   : > { %5583 = vmatpush3.bf16.msra.mxu0 (!%p343_p2), %v6207_v1  ;;  %vm6566_vm2 = vmor (!%p343_p2), %vm760_vm0, %vm761_vm1  ;;  %v6230_v50 = vld [vmem:[%s7469_s4 + $0x90] sm:$0xff] (!%p343_p2)   ;;  %v6231_v54 = vld [vmem:[%s7469_s4 + $0x98] sm:$0xff] (!%p343_p2)  }
   0xc   : > { %5584 = vmatprep.subr.bf16.mxu0 (!%p343_p2), %v6208_v2  ;;  %v6232_v0 = vld [vmem:[%s7469_s4 + $0xa0] sm:$0xff] (!%p343_p2)   ;;  %vm6892_vm7 = vmand (!%p343_p2), %vm2423_vm3, %vm2424_vm4 }
   0xd   : > { %s7485_s14 = smov (!%p395_p3, %s4756_s14), 1  ;;  %vm6899_vm8 = vmand %vm2429_vm5, %vm2430_vm6  ;;  %v6386_v46 = vld [vmem:[%s7471_s6 + $0x220] sm:$0xff]  }
   0xe   : > { %s6482_s21 = smul.u32 72, %s7485_s14  ;;  %vm7011_vm11 = vmor %vm2928_vm9, %vm2929_vm10 }
   0xf   : > { %5585 = vmatpush3.bf16.msra.mxu0 %v6208_v2 }
  0x10   : > { %s6488_s24 = scalar_lea.vmem %s7466_s1, %s6482_s21  ;;  %5586 = vmatprep.subr.bf16.mxu0 %v6209_v3  ;;  %s6504_s15 = scalar_lea.vmem %s7465_s0, %s6482_s21 }
  0x11   : > { %v6214_v4 = vld [vmem:[%s6488_s24] ss:$8 sps:$4 sm:$0xff]   ;;  %v6216_v10 = vld [vmem:[%s6488_s24 + $0x10] ss:$8 sps:$4 sm:$0xff]   ;;  %s6543_s22 = scalar_lea.vmem %s7467_s2, %s6482_s21  ;;  %v745_v26 = vld [vmem:[%s6504_s15 + $0x4] sm:$0x1]  ;;  %s6563_s12 = scalar_lea.vmem %s7468_s3, %s6482_s21 }
  0x12   : > { %5596 = vmatprep.mubr.bf16.mxu0 %v6214_v4  ;;  %v6222_v11 = vld [vmem:[%s6488_s24 + $0x20] ss:$8 sps:$4 sm:$0xff]   ;;  %v6224_v14 = vld [vmem:[%s6488_s24 + $0x30] ss:$8 sps:$4 sm:$0xff]   ;;  %v747_v28 = vld [vmem:[%s6504_s15 + $0xc] sm:$0x1] }
  0x13   : > { %5587 = vmatpush3.bf16.msra.mxu0 %v6209_v3  ;;  %v6226_v15 = vld [vmem:[%s6504_s15] ss:$8 sps:$4 sm:$0xff]   ;;  %v773_v34 = vshll.u32 %v745_v26, 16  ;;  %v787_v35 = vshll.u32 %v747_v28, 16  ;;  %v6228_v36 = vld [vmem:[%s6504_s15 + $0x10] ss:$8 sps:$4 sm:$0xff]  }
  0x14   : > { %5588 = vmatprep.subr.bf16.mxu0 %v6210_v5  ;;  %v744_v19 = vld [vmem:[%s6504_s15] sm:$0xf]  ;;  %v746_v20 = vld [vmem:[%s6504_s15 + $0x8] sm:$0xf]  ;;  %v748_v41 = vld [vmem:[%s6504_s15 + $0x10] sm:$0xf] }
  0x15   : > { %v764_v21 = vshrl.u32 %v744_v19, 16  ;;  %v767_v22 = vshll.u32 %v744_v19, 16  ;;  %v778_v24 = vshrl.u32 %v746_v20, 16  ;;  %v781_v25 = vshll.u32 %v746_v20, 16  ;;  %v6234_v39 = vld [vmem:[%s6504_s15 + $0x20] ss:$8 sps:$4 sm:$0xff]  }
  0x16   : > { %v775_v42 = vrot.slane %v773_v34, 5  ;;  %v789_v43 = vrot.slane %v787_v35, 5  ;;  %v750_v47 = vld [vmem:[%s6504_s15 + $0x18] sm:$0xf]  ;;  %v792_v48 = vshrl.u32 %v748_v41, 16  ;;  %v795_v49 = vshll.u32 %v748_v41, 16 }
  0x17   : > { %5589 = vmatpush3.bf16.msra.mxu0 %v6210_v5  ;;  %v766_v29 = vrot.slane %v764_v21, 4  ;;  %v769_v30 = vrot.slane %v767_v22, 5  ;;  %v780_v31 = vrot.slane %v778_v24, 4  ;;  %v783_v32 = vrot.slane %v781_v25, 5  ;;  %v6236_v53 = vld [vmem:[%s6504_s15 + $0x30] ss:$8 sps:$4 sm:$0xff]  }
  0x18   : > { %5590 = vmatprep.subr.bf16.mxu0 %v6211_v6  ;;  %v806_v55 = vshrl.u32 %v750_v47, 16  ;;  %v809_v56 = vshll.u32 %v750_v47, 16  ;;  %v794_v58 = vrot.slane %v792_v48, 4  ;;  %v797_v59 = vrot.slane %v795_v49, 5  ;;  %v752_v60 = vld [vmem:[%s6504_s15 + $0x20] sm:$0xf] }
  0x19   : > { %v770_v37 = vor.u32 %v769_v30, %v766_v29  ;;  %v784_v38 = vor.u32 %v783_v32, %v780_v31  ;;  %v749_v61 = vld [vmem:[%s6504_s15 + $0x14] sm:$0x1]  ;;  %v751_v62 = vld [vmem:[%s6504_s15 + $0x1c] sm:$0x1]  ;;  %v754_v63 = vld [vmem:[%s6504_s15 + $0x28] sm:$0xf] }
  0x1a   : > { %v808_v1 = vrot.slane %v806_v55, 4  ;;  %v811_v2 = vrot.slane %v809_v56, 5  ;;  %v820_v3 = vshrl.u32 %v752_v60, 16  ;;  %v823_v4 = vshll.u32 %v752_v60, 16  ;;  %v6235_v28 = vld [vmem:[%s7469_s4 + $0xb0] sm:$0xff]   ;;  %v6239_v60 = vld [vmem:[%s7469_s4 + $0xc8] sm:$0xff]  }
  0x1b   : > { %5591 = vmatpush3.bf16.msra.mxu0 %v6211_v6  ;;  %v771_v44 = vrot.slane %v770_v37, 4  ;;  %v785_v45 = vrot.slane %v784_v38, 4  ;;  %v834_v5 = vshrl.u32 %v754_v63, 16  ;;  %v837_v6 = vshll.u32 %v754_v63, 16  ;;  %v757_v35 = vld [vmem:[%s6504_s15 + $0x34] sm:$0x1] }
  0x1c   : > { %5592 = vmatprep.subr.bf16.mxu0 %v6212_v7  ;;  %v759_v37 = vld [vmem:[%s6504_s15 + $0x3c] sm:$0x1] }
  0x1d   : > { %v776_v51 = vsel %vm6566_vm2, %v771_v44, %v775_v42  ;;  %v790_v52 = vsel %vm6566_vm2, %v785_v45, %v789_v43  ;;  %v839_v19 = vrot.slane %v837_v6, 5  ;;  %v857_v45 = vshll.u32 %v757_v35, 16  ;;  %v6245_v6 = vld [vmem:[%s7469_s4 + $0xf8] sm:$0xff]   ;;  %v1377_v35 = vld [vmem:[%s6543_s22 + $0x20] sm:$0xf] }
  0x1e   : > { %v4823_v57 = vcombine.low %v776_v51, %v790_v52  ;;  %v6238_v51 = vld [vmem:[%s7469_s4 + $0xc0] sm:$0xff]  }
  0x1f   : > { %5593 = vmatpush3.bf16.msra.mxu0 %v6212_v7  ;;  %v6233_v7 = vld [vmem:[%s7469_s4 + $0xa8] sm:$0xff]   ;;  %v859_v55 = vrot.slane %v857_v45, 5 }
  0x20   : > { %5594 = vmatprep.subr.bf16.mxu0 %v6213_v8 }
  0x23   : > { %5595 = vmatpush3.bf16.msra.mxu0 %v6213_v8  ;;  %v801_v8 = vshll.u32 %v749_v61, 16  ;;  %v6240_v61 = vld [vmem:[%s7469_s4 + $0xd0] sm:$0xff]  }
  0x24   : > { %5604 = vmatprep.subr.bf16.mxu0 %v6215_v9 }
  0x25   : > { %v803_v26 = vrot.slane %v801_v8, 5  ;;  %v6248_v8 = vld [vmem:[%s6543_s22 + $0x10] ss:$8 sps:$4 sm:$0xff]  }
  0x26   : > { %5597 = vmatmul.mubr.bf16.vlgmr.msra.gmra.mrb[0].mxu0 %v6216_v10  ;;  %v753_v10 = vld [vmem:[%s6504_s15 + $0x24] sm:$0x1] }
  0x27   : > { %5605 = vmatpush3.bf16.msra.mxu0 %v6215_v9  ;;  %5600 = vmatprep.mubr.bf16.mxu0 %v6222_v11  ;;  %v815_v9 = vshll.u32 %v751_v62, 16  ;;  %v755_v11 = vld [vmem:[%s6504_s15 + $0x2c] sm:$0x1]  ;;  %v829_v20 = vshll.u32 %v753_v10, 16 }
  0x28   : > { %5606 = vmatprep.subr.bf16.mxu0 %v6217_v12  ;;  %v843_v21 = vshll.u32 %v755_v11, 16  ;;  %v6249_v10 = vld [vmem:[%s7469_s4 + $0x108] sm:$0xff]   ;;  %v6250_v11 = vld [vmem:[%s7469_s4 + $0x110] sm:$0xff]  }
  0x2a   : > { %v845_v34 = vrot.slane %v843_v21, 5 }
  0x2b   : > { %5607 = vmatpush3.bf16.msra.mxu0 %v6217_v12  ;;  %v798_v12 = vor.u32 %v797_v59, %v794_v58 }
  0x2c   : > { %5608 = vmatprep.subr.bf16.mxu0 %v6218_v13 }
  0x2d   : > { %v799_v29 = vrot.slane %v798_v12, 4  ;;  %v6256_v12 = vld [vmem:[%s6543_s22 + $0x30] ss:$8 sps:$4 sm:$0xff]  }
  0x2e   : > { %5601 = vmatmul.mubr.bf16.gmra.mrb[4].mxu0 %v6224_v14  ;;  %v756_v14 = vld [vmem:[%s6504_s15 + $0x30] sm:$0xf] }
  0x2f   : > { %5609 = vmatpush3.bf16.msra.mxu0 %v6218_v13  ;;  %5620 = vmatprep.mubr.bf16.mxu0 %v6226_v15  ;;  %v812_v13 = vor.u32 %v811_v2, %v808_v1  ;;  %v758_v15 = vld [vmem:[%s6504_s15 + $0x38] sm:$0xf]  ;;  %v848_v22 = vshrl.u32 %v756_v14, 16  ;;  %v804_v44 = vsel %vm6566_vm2, %v799_v29, %v803_v26  ;;  %v6246_v2 = vld [vmem:[%s6543_s22] ss:$8 sps:$4 sm:$0xff]  }
  0x30   : > { %5610 = vmatprep.subr.bf16.mxu0 %v6219_v16  ;;  %v862_v24 = vshrl.u32 %v758_v15, 16  ;;  %v865_v25 = vshll.u32 %v758_v15, 16  ;;  %v1369_v15 = vld [vmem:[%s6543_s22] sm:$0xf] }
  0x31   : > { %v813_v30 = vrot.slane %v812_v13, 4  ;;  %v850_v38 = vrot.slane %v848_v22, 4  ;;  %v6258_v13 = vld [vmem:[%s6563_s12] ss:$8 sps:$4 sm:$0xff]  }
  0x32   : > { %v867_v41 = vrot.slane %v865_v25, 5  ;;  %v1372_v25 = vld [vmem:[%s6543_s22 + $0xc] sm:$0x1] }
  0x33   : > { %5611 = vmatpush3.bf16.msra.mxu0 %v6219_v16  ;;  %v822_v16 = vrot.slane %v820_v3, 4  ;;  %v6242_v3 = vld [vmem:[%s7469_s4 + $0xe0] sm:$0xff]  }
  0x34   : > { %5612 = vmatprep.subr.bf16.mxu0 %v6220_v17 }
  0x37   : > { %5613 = vmatpush3.bf16.msra.mxu0 %v6220_v17  ;;  %v825_v17 = vrot.slane %v823_v4, 5  ;;  %v6243_v4 = vld [vmem:[%s7469_s4 + $0xe8] sm:$0xff]  }
  0x38   : > { %5614 = vmatprep.subr.bf16.mxu0 %v6221_v18 }
  0x39   : > { %v826_v31 = vor.u32 %v825_v17, %v822_v16  ;;  %v6252_v16 = vld [vmem:[%s7469_s4 + $0x120] sm:$0xff]   ;;  %v1371_v17 = vld [vmem:[%s6543_s22 + $0x8] sm:$0xf] }
  0x3a   : > { %v1400_v21 = vshrl.u32 %v1371_v17, 16  ;;  %v1403_v22 = vshll.u32 %v1371_v17, 16  ;;  %v1382_v17 = vld [vmem:[%s6543_s22 + $0x34] sm:$0x1] }
  0x3b   : > { %5615 = vmatpush3.bf16.msra.mxu0 %v6221_v18  ;;  %v836_v18 = vrot.slane %v834_v5, 4  ;;  %v827_v42 = vrot.slane %v826_v31, 4  ;;  %v6244_v5 = vld [vmem:[%s7469_s4 + $0xf0] sm:$0xff]  }
  0x3c   : > { %5616 = vmatprep.subr.bf16.mxu0 %v6223_v23  ;;  %v1405_v29 = vrot.slane %v1403_v22, 5 }
  0x3d   : > { %v840_v32 = vor.u32 %v839_v19, %v836_v18  ;;  %v1386_v18 = vshrl.u32 %v1369_v15, 16  ;;  %v1389_v19 = vshll.u32 %v1369_v15, 16 }
  0x3f   : > { %5617 = vmatpush3.bf16.msra.mxu0 %v6223_v23  ;;  %v851_v23 = vshll.u32 %v756_v14, 16  ;;  %v841_v43 = vrot.slane %v840_v32, 4  ;;  %v6251_v14 = vld [vmem:[%s7469_s4 + $0x118] sm:$0xff]   ;;  %v1388_v26 = vrot.slane %v1386_v18, 4  ;;  %v1409_v32 = vshll.u32 %v1372_v25, 16 }
  0x40   : > { %5618 = vmatprep.subr.bf16.mxu0 %v6225_v27  ;;  %v1384_v18 = vld [vmem:[%s6543_s22 + $0x3c] sm:$0x1] }
  0x41   : > { %v1411_v45 = vrot.slane %v1409_v32, 5 }
  0x43   : > { %5619 = vmatpush3.bf16.msra.mxu0 %v6225_v27  ;;  %v817_v27 = vrot.slane %v815_v9, 5  ;;  %v6254_v9 = vld [vmem:[%s6543_s22 + $0x20] ss:$8 sps:$4 sm:$0xff]  }
  0x44   : > { %5628 = vmatprep.subr.bf16.mxu0 %v6227_v33 }
  0x45   : > { %v818_v47 = vsel %vm6566_vm2, %v813_v30, %v817_v27  ;;  %v1391_v27 = vrot.slane %v1389_v19, 5  ;;  %v1373_v30 = vld [vmem:[%s6543_s22 + $0x10] sm:$0xf] }
  0x46   : > { %5621 = vmatmul.mubr.bf16.vlgmr.msra.gmra.mrb[0].mxu0 %v6228_v36  ;;  %v6237_v36 = vld [vmem:[%s7469_s4 + $0xb8] sm:$0xff]  }
  0x47   : > { %5629 = vmatpush3.bf16.msra.mxu0 %v6227_v33  ;;  %5624 = vmatprep.mubr.bf16.mxu0 %v6234_v39  ;;  %v831_v33 = vrot.slane %v829_v20, 5  ;;  %v853_v39 = vrot.slane %v851_v23, 5  ;;  %v6253_v20 = vld [vmem:[%s7469_s4 + $0x128] sm:$0xff]   ;;  %v6255_v23 = vld [vmem:[%s7469_s4 + $0x130] sm:$0xff]  }
  0x48   : > { %5630 = vmatprep.subr.bf16.mxu0 %v6229_v40 }
  0x49   : > { %v854_v48 = vor.u32 %v853_v39, %v850_v38  ;;  %v832_v52 = vsel %vm6566_vm2, %v827_v42, %v831_v33  ;;  %v1375_v33 = vld [vmem:[%s6543_s22 + $0x18] sm:$0xf]  ;;  %v1414_v38 = vshrl.u32 %v1373_v30, 16  ;;  %v1417_v39 = vshll.u32 %v1373_v30, 16 }
  0x4a   : > { %v1431_v42 = vshll.u32 %v1375_v33, 16 }
  0x4b   : > { %5631 = vmatpush3.bf16.msra.mxu0 %v6229_v40  ;;  %v864_v40 = vrot.slane %v862_v24, 4  ;;  %v1370_v24 = vld [vmem:[%s6543_s22 + $0x4] sm:$0x1] }
  0x4c   : > { %5632 = vmatprep.subr.bf16.mxu0 %v6230_v50  ;;  %v1395_v31 = vshll.u32 %v1370_v24, 16 }
  0x4d   : > { %v868_v49 = vor.u32 %v867_v41, %v864_v40  ;;  %v1379_v40 = vld [vmem:[%s6543_s22 + $0x28] sm:$0xf]  ;;  %v1428_v41 = vshrl.u32 %v1375_v33, 16 }
  0x4e   : > { %5625 = vmatmul.mubr.bf16.gmra.mrb[4].mxu0 %v6236_v53  ;;  %v846_v53 = vsel %vm6566_vm2, %v841_v43, %v845_v34  ;;  %v6257_v34 = vld [vmem:[%s7469_s4 + $0x138] sm:$0xff]   ;;  %v6259_v43 = vld [vmem:[%s7469_s4 + $0x140] sm:$0xff]  }
  0x4f   : > { %5633 = vmatpush3.bf16.msra.mxu0 %v6230_v50  ;;  %5644 = vmatprep.mubr.bf16.mxu0 %v4823_v57  ;;  %v871_v50 = vshll.u32 %v759_v37, 16  ;;  %v4825_v56 = vcombine.low %v832_v52, %v846_v53  ;;  %v855_v57 = vrot.slane %v854_v48, 4  ;;  %v869_v58 = vrot.slane %v868_v49, 4  ;;  %v6260_v49 = vld [vmem:[%s6563_s12 + $0x10] ss:$8 sps:$4 sm:$0xff]  }
  0x50   : > { %5634 = vmatprep.subr.bf16.mxu0 %v6231_v54  ;;  %v1445_v48 = vshll.u32 %v1377_v35, 16  ;;  %v1456_v52 = vshrl.u32 %v1379_v40, 16  ;;  %v1459_v53 = vshll.u32 %v1379_v40, 16 }
  0x51   : > { %v873_v59 = vrot.slane %v871_v50, 5  ;;  %v860_v62 = vsel %vm6566_vm2, %v855_v57, %v859_v55  ;;  %v1374_v50 = vld [vmem:[%s6543_s22 + $0x14] sm:$0x1]  ;;  %v6266_v55 = vld [vmem:[%s6563_s12 + $0x20] ss:$8 sps:$4 sm:$0xff]  }
  0x53   : > { %5635 = vmatpush3.bf16.msra.mxu0 %v6231_v54  ;;  %v4824_v54 = vcombine.low %v804_v44, %v818_v47  ;;  %v874_v63 = vsel %vm6566_vm2, %v869_v58, %v873_v59  ;;  %v1397_v44 = vrot.slane %v1395_v31, 5  ;;  %v1442_v47 = vshrl.u32 %v1377_v35, 16 }
  0x54   : > { %5636 = vmatprep.subr.bf16.mxu0 %v6232_v0  ;;  %v4826_v1 = vcombine.low %v860_v62, %v874_v63  ;;  %v1416_v58 = vrot.slane %v1414_v38, 4  ;;  %v1419_v59 = vrot.slane %v1417_v39, 5  ;;  %v1430_v62 = vrot.slane %v1428_v41, 4 }
  0x55   : > { %v1433_v63 = vrot.slane %v1431_v42, 5 }
  0x56   : > { %v1420_v15 = vor.u32 %v1419_v59, %v1416_v58 }
  0x57   : > { %5637 = vmatpush3.bf16.msra.mxu0 %v6232_v0  ;;  %v6241_v0 = vld [vmem:[%s7469_s4 + $0xd8] sm:$0xff]  }
  0x58   : > { %5638 = vmatprep.subr.bf16.mxu0 %v6233_v7  ;;  %v1421_v30 = vrot.slane %v1420_v15, 4  ;;  %v4991_v15 = vld [vmem:[%s6504_s15 + $0x8] sm:$0xf] }
  0x5b   : > { %5639 = vmatpush3.bf16.msra.mxu0 %v6233_v7  ;;  %v6247_v7 = vld [vmem:[%s7469_s4 + $0x100] sm:$0xff]  }
  0x5c   : > { %5640 = vmatprep.subr.bf16.mxu0 %v6235_v28 }
  0x5f   : > { %5641 = vmatpush3.bf16.msra.mxu0 %v6235_v28  ;;  %v1402_v28 = vrot.slane %v1400_v21, 4 }
  0x60   : > { %5642 = vmatprep.subr.bf16.mxu0 %v6237_v36 }
  0x61   : > { %v1406_v37 = vor.u32 %v1405_v29, %v1402_v28  ;;  %v1479_v28 = vshll.u32 %v1382_v17, 16  ;;  %v1493_v29 = vshll.u32 %v1384_v18, 16  ;;  %v6287_v17 = vld [vmem:[%s7469_s4 + $0x1f0] sm:$0xff]   ;;  %v2010_v18 = vshrl.u32 %v4991_v15, 16 }
  0x63   : > { %5643 = vmatpush3.bf16.msra.mxu0 %v6237_v36  ;;  %v1392_v36 = vor.u32 %v1391_v27, %v1388_v26  ;;  %v1407_v57 = vrot.slane %v1406_v37, 4  ;;  %v6268_v27 = vld [vmem:[%s6563_s12 + $0x30] ss:$8 sps:$4 sm:$0xff]   ;;  %v1481_v42 = vrot.slane %v1479_v28, 5  ;;  %v4994_v28 = vld [vmem:[%s6504_s15 + $0x14] sm:$0x1] }
  0x64   : > { %5652 = vmatprep.subr.bf16.mxu0 %v6238_v51  ;;  %v6263_v37 = vld [vmem:[%s7469_s4 + $0x158] sm:$0xff]  }
  0x66   : > { %5645 = vmatmul.mubr.bf16.vlgmr.msra.gmra.mrb[0].mxu0 %v4824_v54  ;;  %v1381_v54 = vld [vmem:[%s6543_s22 + $0x30] sm:$0xf] }
  0x67   : > { %5653 = vmatpush3.bf16.msra.mxu0 %v6238_v51  ;;  %5648 = vmatprep.mubr.bf16.mxu0 %v4825_v56  ;;  %v1376_v51 = vld [vmem:[%s6543_s22 + $0x1c] sm:$0x1]  ;;  %v1393_v56 = vrot.slane %v1392_v36, 4 }
  0x68   : > { %5654 = vmatprep.subr.bf16.mxu0 %v6239_v60 }
  0x6b   : > { %5655 = vmatpush3.bf16.msra.mxu0 %v6239_v60  ;;  %v1383_v60 = vld [vmem:[%s6543_s22 + $0x38] sm:$0xf] }
  0x6c   : > { %5656 = vmatprep.subr.bf16.mxu0 %v6240_v61 }
  0x6e   : > { %5649 = vmatmul.mubr.bf16.gmra.mrb[4].mxu0 %v4826_v1  ;;  %v1380_v1 = vld [vmem:[%s6543_s22 + $0x2c] sm:$0x1] }
  0x6f   : > { %5657 = vmatpush3.bf16.msra.mxu0 %v6240_v61  ;;  %5668 = vmatprep.mubr.bf16.mxu0 %v6246_v2  ;;  %v6261_v61 = vld [vmem:[%s7469_s4 + $0x148] sm:$0xff]   ;;  %v1444_v2 = vrot.slane %v1442_v47, 4 }
  0x70   : > { %5658 = vmatprep.subr.bf16.mxu0 %v6241_v0 }
  0x73   : > { %5659 = vmatpush3.bf16.msra.mxu0 %v6241_v0  ;;  %v1378_v0 = vld [vmem:[%s6543_s22 + $0x24] sm:$0x1] }
  0x74   : > { %5660 = vmatprep.subr.bf16.mxu0 %v6242_v3  ;;  %v1451_v19 = vshll.u32 %v1378_v0, 16  ;;  %v6273_v0 = vld [vmem:[%s7469_s4 + $0x198] sm:$0xff]  }
  0x76   : > { %v1453_v35 = vrot.slane %v1451_v19, 5  ;;  %v2013_v19 = vshll.u32 %v4991_v15, 16 }
  0x77   : > { %5661 = vmatpush3.bf16.msra.mxu0 %v6242_v3  ;;  %v1447_v3 = vrot.slane %v1445_v48, 5  ;;  %v6265_v48 = vld [vmem:[%s7469_s4 + $0x168] sm:$0xff]  }
  0x78   : > { %5662 = vmatprep.subr.bf16.mxu0 %v6243_v4 }
  0x7b   : > { %5663 = vmatpush3.bf16.msra.mxu0 %v6243_v4  ;;  %v1470_v4 = vshrl.u32 %v1381_v54, 16 }
  0x7c   : > { %5664 = vmatprep.subr.bf16.mxu0 %v6244_v5 }
  0x7d   : > { %v1472_v21 = vrot.slane %v1470_v4, 4  ;;  %v6277_v4 = vld [vmem:[%s7469_s4 + $0x1b8] sm:$0xff]  }
  0x7f   : > { %5665 = vmatpush3.bf16.msra.mxu0 %v6244_v5  ;;  %v1473_v5 = vshll.u32 %v1381_v54, 16 }
  0x80   : > { %5666 = vmatprep.subr.bf16.mxu0 %v6245_v6 }
  0x81   : > { %v1475_v22 = vrot.slane %v1473_v5, 5  ;;  %v6279_v5 = vld [vmem:[%s7469_s4 + $0x1c0] sm:$0xff]  }
  0x83   : > { %5667 = vmatpush3.bf16.msra.mxu0 %v6245_v6  ;;  %v1458_v6 = vrot.slane %v1456_v52, 4  ;;  %v1476_v40 = vor.u32 %v1475_v22, %v1472_v21  ;;  %v6289_v22 = vld [vmem:[%s7469_s4 + $0x1f8] sm:$0xff]  }
  0x84   : > { %5676 = vmatprep.subr.bf16.mxu0 %v6247_v7 }
  0x86   : > { %5669 = vmatmul.mubr.bf16.vlgmr.msra.gmra.mrb[0].mxu0 %v6248_v8  ;;  %v1484_v8 = vshrl.u32 %v1383_v60, 16 }
  0x87   : > { %5677 = vmatpush3.bf16.msra.mxu0 %v6247_v7  ;;  %5672 = vmatprep.mubr.bf16.mxu0 %v6254_v9  ;;  %v1461_v7 = vrot.slane %v1459_v53, 5  ;;  %v1487_v9 = vshll.u32 %v1383_v60, 16 }
  0x88   : > { %5678 = vmatprep.subr.bf16.mxu0 %v6249_v10  ;;  %v1486_v25 = vrot.slane %v1484_v8, 4  ;;  %v6281_v8 = vld [vmem:[%s7469_s4 + $0x1c8] sm:$0xff]  }
  0x89   : > { %v1462_v24 = vor.u32 %v1461_v7, %v1458_v6  ;;  %v1489_v26 = vrot.slane %v1487_v9, 5  ;;  %v6280_v6 = vld [vmem:[%s6504_s15 + $0x18] ss:$8 sps:$4 sm:$0xff]   ;;  %v6286_v7 = vld [vmem:[%s6504_s15 + $0x28] ss:$8 sps:$4 sm:$0xff]  }
  0x8a   : > { %v6282_v9 = vld [vmem:[%s7469_s4 + $0x1d0] sm:$0xff]  }
  0x8b   : > { %5679 = vmatpush3.bf16.msra.mxu0 %v6249_v10  ;;  %v1423_v10 = vshll.u32 %v1374_v50, 16  ;;  %v1463_v39 = vrot.slane %v1462_v24, 4  ;;  %v1490_v41 = vor.u32 %v1489_v26, %v1486_v25  ;;  %v6269_v50 = vld [vmem:[%s7469_s4 + $0x178] sm:$0xff]   ;;  %v2015_v24 = vrot.slane %v2013_v19, 5 }
  0x8c   : > { %5680 = vmatprep.subr.bf16.mxu0 %v6250_v11 }
  0x8d   : > { %v1425_v31 = vrot.slane %v1423_v10, 5  ;;  %v1491_v47 = vrot.slane %v1490_v41, 4  ;;  %v6288_v10 = vld [vmem:[%s6504_s15 + $0x38] ss:$8 sps:$4 sm:$0xff]   ;;  %v6294_v41 = vld [vmem:[%s7469_s4 + $0x210] sm:$0xff]  }
  0x8e   : > { %5673 = vmatmul.mubr.bf16.gmra.mrb[4].mxu0 %v6256_v12  ;;  %v6262_v12 = vld [vmem:[%s7469_s4 + $0x150] sm:$0xff]  }
  0x8f   : > { %5681 = vmatpush3.bf16.msra.mxu0 %v6250_v11  ;;  %5692 = vmatprep.mubr.bf16.mxu0 %v6258_v13  ;;  %v1437_v11 = vshll.u32 %v1376_v51, 16  ;;  %v1398_v13 = vsel %vm6566_vm2, %v1393_v56, %v1397_v44  ;;  %v6264_v44 = vld [vmem:[%s7469_s4 + $0x160] sm:$0xff]   ;;  %v1426_v52 = vsel %vm6566_vm2, %v1421_v30, %v1425_v31 }
  0x90   : > { %5682 = vmatprep.subr.bf16.mxu0 %v6251_v14  ;;  %v6270_v51 = vld [vmem:[%s7469_s4 + $0x180] sm:$0xff]  }
  0x91   : > { %v1439_v33 = vrot.slane %v1437_v11, 5  ;;  %v6290_v11 = vld [vmem:[%s6488_s24 + $0x8] ss:$8 sps:$4 sm:$0xff]  }
  0x93   : > { %5683 = vmatpush3.bf16.msra.mxu0 %v6251_v14  ;;  %v1412_v14 = vsel %vm6566_vm2, %v1407_v57, %v1411_v45  ;;  %v1477_v45 = vrot.slane %v1476_v40, 4  ;;  %v6271_v57 = vld [vmem:[%s7469_s4 + $0x188] sm:$0xff]  }
  0x94   : > { %5684 = vmatprep.subr.bf16.mxu0 %v6252_v16 }
  0x95   : > { %v1482_v59 = vsel %vm6566_vm2, %v1477_v45, %v1481_v42 }
  0x97   : > { %5685 = vmatpush3.bf16.msra.mxu0 %v6252_v16  ;;  %v1434_v16 = vor.u32 %v1433_v63, %v1430_v62  ;;  %v6278_v63 = vld [vmem:[%s6504_s15 + $0x8] ss:$8 sps:$4 sm:$0xff]  }
  0x98   : > { %5686 = vmatprep.subr.bf16.mxu0 %v6253_v20 }
  0x99   : > { %v1435_v32 = vrot.slane %v1434_v16, 4  ;;  %v4993_v16 = vld [vmem:[%s6504_s15 + $0x10] sm:$0xf] }
  0x9a   : > { %v2027_v21 = vshll.u32 %v4993_v16, 16 }
  0x9b   : > { %5687 = vmatpush3.bf16.msra.mxu0 %v6253_v20  ;;  %v1465_v20 = vshll.u32 %v1380_v1, 16  ;;  %v1440_v53 = vsel %vm6566_vm2, %v1435_v32, %v1439_v33  ;;  %v6274_v1 = vld [vmem:[%s7469_s4 + $0x1a0] sm:$0xff]   ;;  %v2033_v33 = vshll.u32 %v4994_v28, 16 }
  0x9c   : > { %5688 = vmatprep.subr.bf16.mxu0 %v6255_v23  ;;  %v4908_v56 = vcombine.low %v1426_v52, %v1440_v53  ;;  %v2029_v26 = vrot.slane %v2027_v21, 5 }
  0x9d   : > { %v1467_v36 = vrot.slane %v1465_v20, 5  ;;  %v2024_v20 = vshrl.u32 %v4993_v16, 16  ;;  %v2035_v40 = vrot.slane %v2033_v33, 5 }
  0x9f   : > { %5689 = vmatpush3.bf16.msra.mxu0 %v6255_v23  ;;  %v1448_v23 = vor.u32 %v1447_v3, %v1444_v2  ;;  %v6275_v2 = vld [vmem:[%s7469_s4 + $0x1a8] sm:$0xff]   ;;  %v6276_v3 = vld [vmem:[%s7469_s4 + $0x1b0] sm:$0xff]   ;;  %v2026_v25 = vrot.slane %v2024_v20, 4 }
  0xa0   : > { %5690 = vmatprep.subr.bf16.mxu0 %v6257_v34  ;;  %v6300_v20 = vld [vmem:[%s7469_s4 + $0x230] sm:$0xff]  }
  0xa1   : > { %v1449_v38 = vrot.slane %v1448_v23, 4  ;;  %v2012_v23 = vrot.slane %v2010_v18, 4  ;;  %v2030_v32 = vor.u32 %v2029_v26, %v2026_v25  ;;  %v6301_v25 = vld [vmem:[%s7469_s4 + $0x238] sm:$0xff]  }
  0xa3   : > { %5691 = vmatpush3.bf16.msra.mxu0 %v6257_v34  ;;  %v4907_v34 = vcombine.low %v1398_v13, %v1412_v14  ;;  %v1454_v54 = vsel %vm6566_vm2, %v1449_v38, %v1453_v35  ;;  %v6284_v13 = vld [vmem:[%s7469_s4 + $0x1e0] sm:$0xff]   ;;  %v6285_v14 = vld [vmem:[%s7469_s4 + $0x1e8] sm:$0xff]   ;;  %v2016_v30 = vor.u32 %v2015_v24, %v2012_v23 }
  0xa4   : > { %5700 = vmatprep.subr.bf16.mxu0 %v6259_v43  ;;  %v6298_v35 = vld [vmem:[%s6488_s24 + $0x28] ss:$8 sps:$4 sm:$0xff]  }
  0xa6   : > { %5693 = vmatmul.mubr.bf16.vlgmr.msra.gmra.mrb[0].mxu0 %v6260_v49  ;;  %v6267_v49 = vld [vmem:[%s7469_s4 + $0x170] sm:$0xff]  }
  0xa7   : > { %5701 = vmatpush3.bf16.msra.mxu0 %v6259_v43  ;;  %5696 = vmatprep.mubr.bf16.mxu0 %v6266_v55  ;;  %v1495_v43 = vrot.slane %v1493_v29, 5  ;;  %v1468_v55 = vsel %vm6566_vm2, %v1463_v39, %v1467_v36  ;;  %v6291_v29 = vld [vmem:[%s7469_s4 + $0x200] sm:$0xff]   ;;  %v6293_v36 = vld [vmem:[%s7469_s4 + $0x208] sm:$0xff]   ;;  %v2031_v39 = vrot.slane %v2030_v32, 4 }
  0xa8   : > { %5702 = vmatprep.subr.bf16.mxu0 %v6261_v61  ;;  %v4909_v58 = vcombine.low %v1454_v54, %v1468_v55 }
  0xa9   : > { %v1496_v60 = vsel %vm6566_vm2, %v1491_v47, %v1495_v43  ;;  %v2036_v43 = vsel %vm6566_vm2, %v2031_v39, %v2035_v40  ;;  %v4995_v47 = vld [vmem:[%s6504_s15 + $0x18] sm:$0xf]  ;;  %v5006_v39 = vld [vmem:[%s6504_s15 + $0x44] sm:$0x1] }
  0xaa   : > { %v4910_v62 = vcombine.low %v1482_v59, %v1496_v60  ;;  %v2038_v52 = vshrl.u32 %v4995_v47, 16  ;;  %v2041_v53 = vshll.u32 %v4995_v47, 16 }
  0xab   : > { %5703 = vmatpush3.bf16.msra.mxu0 %v6261_v61  ;;  %v6272_v61 = vld [vmem:[%s7469_s4 + $0x190] sm:$0xff]  }
  0xac   : > { %5704 = vmatprep.subr.bf16.mxu0 %v6262_v12 }
  0xae   : > { %5697 = vmatmul.mubr.bf16.gmra.mrb[4].mxu0 %v6268_v27  ;;  %v4992_v27 = vld [vmem:[%s6504_s15 + $0xc] sm:$0x1] }
  0xaf   : > { %5705 = vmatpush3.bf16.msra.mxu0 %v6262_v12  ;;  %5716 = vmatprep.mubr.bf16.mxu0 %v4907_v34  ;;  %v6283_v12 = vld [vmem:[%s7469_s4 + $0x1d8] sm:$0xff]   ;;  %v2019_v31 = vshll.u32 %v4992_v27, 16 }
  0xb0   : > { %5706 = vmatprep.subr.bf16.mxu0 %v6263_v37  ;;  %v6292_v34 = vld [vmem:[%s6488_s24 + $0x18] ss:$8 sps:$4 sm:$0xff]  }
  0xb1   : > { %v2021_v38 = vrot.slane %v2019_v31, 5 }
  0xb3   : > { %5707 = vmatpush3.bf16.msra.mxu0 %v6263_v37  ;;  %v2017_v37 = vrot.slane %v2016_v30, 4  ;;  %v5004_v30 = vld [vmem:[%s6504_s15 + $0x3c] sm:$0x1] }
  0xb4   : > { %5708 = vmatprep.subr.bf16.mxu0 %v6264_v44 }
  0xb5   : > { %v2022_v42 = vsel %vm6566_vm2, %v2017_v37, %v2021_v38 }
  0xb6   : > { %v5023_v45 = vcombine.low %v2022_v42, %v2036_v43 }
  0xb7   : > { %5709 = vmatpush3.bf16.msra.mxu0 %v6264_v44  ;;  %v6299_v44 = vld [vmem:[%s6488_s24 + $0x38] ss:$8 sps:$4 sm:$0xff]  }
  0xb8   : > { %5710 = vmatprep.subr.bf16.mxu0 %v6265_v48 }
  0xbb   : > { %5711 = vmatpush3.bf16.msra.mxu0 %v6265_v48  ;;  %v4997_v48 = vld [vmem:[%s6504_s15 + $0x20] sm:$0xf] }
  0xbc   : > { %5712 = vmatprep.subr.bf16.mxu0 %v6267_v49  ;;  %v2052_v54 = vshrl.u32 %v4997_v48, 16  ;;  %v2055_v55 = vshll.u32 %v4997_v48, 16 }
  0xbf   : > { %5713 = vmatpush3.bf16.msra.mxu0 %v6267_v49  ;;  %v6295_v49 = vld [vmem:[%s7469_s4 + $0x218] sm:$0xff]  }
  0xc0   : > { %5714 = vmatprep.subr.bf16.mxu0 %v6269_v50 }
  0xc3   : > { %5715 = vmatpush3.bf16.msra.mxu0 %v6269_v50  ;;  %v4999_v50 = vld [vmem:[%s6504_s15 + $0x28] sm:$0xf] }
  0xc4   : > { %5724 = vmatprep.subr.bf16.mxu0 %v6270_v51 }
  0xc6   : > { %5717 = vmatmul.mubr.bf16.vlgmr.msra.gmra.mrb[0].mxu0 %v4908_v56  ;;  %v6296_v56 = vld [vmem:[%s7469_s4 + $0x220] sm:$0xff]  }
  0xc7   : > { %5725 = vmatpush3.bf16.msra.mxu0 %v6270_v51  ;;  %5720 = vmatprep.mubr.bf16.mxu0 %v4909_v58  ;;  %v5001_v51 = vld [vmem:[%s6504_s15 + $0x30] sm:$0xf]  ;;  %v2069_v58 = vshll.u32 %v4999_v50, 16 }
  0xc8   : > { %5726 = vmatprep.subr.bf16.mxu0 %v6271_v57  ;;  %v2080_v59 = vshrl.u32 %v5001_v51, 16  ;;  %v2083_v60 = vshll.u32 %v5001_v51, 16 }
  0xcb   : > { %5727 = vmatpush3.bf16.msra.mxu0 %v6271_v57  ;;  %v2066_v57 = vshrl.u32 %v4999_v50, 16 }
  0xcc   : > { %5728 = vmatprep.subr.bf16.mxu0 %v6272_v61 }
  0xce   : > { %5721 = vmatmul.mubr.bf16.gmra.mrb[4].mxu0 %v4910_v62  ;;  %v2040_v62 = vrot.slane %v2038_v52, 4 }
  0xcf   : > { %5729 = vmatpush3.bf16.msra.mxu0 %v6272_v61  ;;  %5740 = vmatprep.mubr.bf16.mxu0 %v6278_v63  ;;  %v6297_v61 = vld [vmem:[%s7469_s4 + $0x228] sm:$0xff]   ;;  %v2043_v63 = vrot.slane %v2041_v53, 5 }
  0xd0   : > { %5730 = vmatprep.subr.bf16.mxu0 %v6273_v0 }
  0xd3   : > { %5731 = vmatpush3.bf16.msra.mxu0 %v6273_v0  ;;  %v2054_v0 = vrot.slane %v2052_v54, 4 }
  0xd4   : > { %5732 = vmatprep.subr.bf16.mxu0 %v6274_v1 }
  0xd7   : > { %5733 = vmatpush3.bf16.msra.mxu0 %v6274_v1  ;;  %v2057_v1 = vrot.slane %v2055_v55, 5 }
  0xd8   : > { %5734 = vmatprep.subr.bf16.mxu0 %v6275_v2 }
  0xdb   : > { %5735 = vmatpush3.bf16.msra.mxu0 %v6275_v2  ;;  %v4996_v2 = vld [vmem:[%s6504_s15 + $0x1c] sm:$0x1] }
  0xdc   : > { %5736 = vmatprep.subr.bf16.mxu0 %v6276_v3 }
  0xdf   : > { %5737 = vmatpush3.bf16.msra.mxu0 %v6276_v3  ;;  %v4998_v3 = vld [vmem:[%s6504_s15 + $0x24] sm:$0x1] }
  0xe0   : > { %5738 = vmatprep.subr.bf16.mxu0 %v6277_v4  ;;  %v2061_v15 = vshll.u32 %v4998_v3, 16  ;;  %v6867_v3 = vld [vmem:[%s7471_s6] sm:$0xff]  }
  0xe3   : > { %5739 = vmatpush3.bf16.msra.mxu0 %v6277_v4  ;;  %v5003_v4 = vld [vmem:[%s6504_s15 + $0x38] sm:$0xf] }
  0xe4   : > { %5748 = vmatprep.subr.bf16.mxu0 %v6279_v5  ;;  %v2094_v16 = vshrl.u32 %v5003_v4, 16 }
  0xe6   : > { %5741 = vmatmul.mubr.bf16.vlgmr.msra.gmra.mrb[0].mxu0 %v6280_v6  ;;  %v2071_v6 = vrot.slane %v2069_v58, 5  ;;  %v2096_v31 = vrot.slane %v2094_v16, 4  ;;  %v6302_v58 = vld [vmem:[%s7471_s6 + $0x40] sm:$0xff]  }
  0xe7   : > { %5749 = vmatpush3.bf16.msra.mxu0 %v6279_v5  ;;  %5744 = vmatprep.mubr.bf16.mxu0 %v6286_v7  ;;  %v2068_v5 = vrot.slane %v2066_v57, 4  ;;  %v2082_v7 = vrot.slane %v2080_v59, 4  ;;  %v6406_v59 = vmov 0  }
  0xe8   : > { %5750 = vmatprep.subr.bf16.mxu0 %v6281_v8  ;;  %5796 = vmatprep.subr.bf16.mxu1 %v6302_v58  ;;  %2308 = vst [vmem:[#allocation2 + $0x18] sm:$0xf] %v6406_v59  ;;  %2309 = vst [vmem:[#allocation2 + $0x1c] sm:$0x1] %v6406_v59 }
  0xe9   : > { %v2072_v21 = vor.u32 %v2071_v6, %v2068_v5  ;;  %2302 = vst [vmem:[#allocation2] sm:$0xf] %v6406_v59  ;;  %2303 = vst [vmem:[#allocation2 + $0x4] sm:$0x1] %v6406_v59  ;;  %5797 = vmatpush3.bf16.msra.mxu1 %v6302_v58 }
  0xea   : > { %2304 = vst [vmem:[#allocation2 + $0x8] sm:$0xf] %v6406_v59  ;;  %2305 = vst [vmem:[#allocation2 + $0xc] sm:$0x1] %v6406_v59 }
  0xeb   : > { %5751 = vmatpush3.bf16.msra.mxu0 %v6281_v8  ;;  %v2085_v8 = vrot.slane %v2083_v60, 5  ;;  %2306 = vst [vmem:[#allocation2 + $0x10] sm:$0xf] %v6406_v59  ;;  %2307 = vst [vmem:[#allocation2 + $0x14] sm:$0x1] %v6406_v59  ;;  %v6303_v60 = vld [vmem:[%s7471_s6 + $0x48] sm:$0xff]  }
  0xec   : > { %5752 = vmatprep.subr.bf16.mxu0 %v6282_v9  ;;  %2310 = vst [vmem:[#allocation2 + $0x20] sm:$0xf] %v6406_v59  ;;  %2311 = vst [vmem:[#allocation2 + $0x24] sm:$0x1] %v6406_v59  ;;  %5798 = vmatprep.subr.bf16.mxu1 %v6303_v60 }
  0xed   : > { %v2086_v23 = vor.u32 %v2085_v8, %v2082_v7  ;;  %2312 = vst [vmem:[#allocation2 + $0x28] sm:$0xf] %v6406_v59  ;;  %2313 = vst [vmem:[#allocation2 + $0x2c] sm:$0x1] %v6406_v59  ;;  %5799 = vmatpush3.bf16.msra.mxu1 %v6303_v60 }
  0xee   : > { %5745 = vmatmul.mubr.bf16.gmra.mrb[4].mxu0 %v6288_v10  ;;  %v5000_v10 = vld [vmem:[%s6504_s15 + $0x2c] sm:$0x1]  ;;  %2314 = vst [vmem:[#allocation2 + $0x30] sm:$0xf] %v6406_v59  ;;  %2315 = vst [vmem:[#allocation2 + $0x34] sm:$0x1] %v6406_v59 }
  0xef   : > { %5753 = vmatpush3.bf16.msra.mxu0 %v6282_v9  ;;  %5764 = vmatprep.mubr.bf16.mxu0 %v6290_v11  ;;  %v5005_v9 = vld [vmem:[%s6504_s15 + $0x40] sm:$0xf]  ;;  %v5002_v11 = vld [vmem:[%s6504_s15 + $0x34] sm:$0x1]  ;;  %v2087_v37 = vrot.slane %v2086_v23, 4 }
  0xf0   : > { %5754 = vmatprep.subr.bf16.mxu0 %v6283_v12  ;;  %v2108_v18 = vshrl.u32 %v5005_v9, 16  ;;  %v2111_v19 = vshll.u32 %v5005_v9, 16  ;;  %v2089_v24 = vshll.u32 %v5002_v11, 16  ;;  %2316 = vst [vmem:[#allocation2 + $0x38] sm:$0xf] %v6406_v59 }
  0xf1   : > { %2317 = vst [vmem:[#allocation2 + $0x3c] sm:$0x1] %v6406_v59  ;;  %2318 = vst [vmem:[#allocation2 + $0x40] sm:$0xf] %v6406_v59  ;;  %v6875_v6 = vld [vmem:[#allocation2] sm:$0xf] }
  0xf2   : > { %v2110_v33 = vrot.slane %v2108_v18, 4  ;;  %v2091_v38 = vrot.slane %v2089_v24, 5  ;;  %2319 = vst [vmem:[#allocation2 + $0x44] sm:$0x1] %v6406_v59  ;;  %2320 = vst [vmem:[#allocation2 + $0x48] sm:$0xf] %v6406_v59 }
  0xf3   : > { %5755 = vmatpush3.bf16.msra.mxu0 %v6283_v12  ;;  %v2044_v12 = vor.u32 %v2043_v63, %v2040_v62  ;;  %2321 = vst [vmem:[#allocation2 + $0x4c] sm:$0x1] %v6406_v59  ;;  %v6305_v62 = vld [vmem:[%s7471_s6 + $0x58] sm:$0xff]   ;;  %v6306_v63 = vld [vmem:[%s7471_s6 + $0x60] sm:$0xff]  }
  0xf4   : > { %5756 = vmatprep.subr.bf16.mxu0 %v6284_v13  ;;  %v2092_v48 = vsel %vm6566_vm2, %v2087_v37, %v2091_v38  ;;  %v2426_v37 = vld [vmem:[#allocation2 + $0x8] sm:$0xf]  ;;  %v2450_v58 = vld [vmem:[#allocation2 + $0x24] sm:$0x1] }
  0xf5   : > { %v2045_v26 = vrot.slane %v2044_v12, 4 }
  0xf7   : > { %5757 = vmatpush3.bf16.msra.mxu0 %v6284_v13  ;;  %v2047_v13 = vshll.u32 %v4996_v2, 16  ;;  %v6309_v2 = vld [vmem:[%s7471_s6 + $0x78] sm:$0xff]  }
  0xf8   : > { %5758 = vmatprep.subr.bf16.mxu0 %v6285_v14 }
  0xf9   : > { %v2049_v27 = vrot.slane %v2047_v13, 5 }
  0xfb   : > { %5759 = vmatpush3.bf16.msra.mxu0 %v6285_v14  ;;  %v2058_v14 = vor.u32 %v2057_v1, %v2054_v0  ;;  %v2050_v40 = vsel %vm6566_vm2, %v2045_v26, %v2049_v27  ;;  %v6307_v0 = vld [vmem:[%s7471_s6 + $0x68] sm:$0xff]   ;;  %v6308_v1 = vld [vmem:[%s7471_s6 + $0x70] sm:$0xff]  }
  0xfc   : > { %5760 = vmatprep.subr.bf16.mxu0 %v6287_v17 }
  0xfd   : > { %v2059_v28 = vrot.slane %v2058_v14, 4  ;;  %v2510_v14 = vshrl.u32 %v6875_v6, 16 }
  0xff   : > { %5761 = vmatpush3.bf16.msra.mxu0 %v6287_v17  ;;  %v2097_v17 = vshll.u32 %v5003_v4, 16  ;;  %v6873_v4 = vld [vmem:[%s7470_s5] ss:$0 sm:$0xff]  ;;  %v6886_v26 = vrot.slane %v2510_v14, 4 }
 0x100   : > { %5762 = vmatprep.subr.bf16.mxu0 %v6289_v22 }
 0x101   : > { %v2099_v32 = vrot.slane %v2097_v17, 5 }
 0x103   : > { %5763 = vmatpush3.bf16.msra.mxu0 %v6289_v22  ;;  %v2075_v22 = vshll.u32 %v5000_v10, 16  ;;  %v2100_v43 = vor.u32 %v2099_v32, %v2096_v31 }
 0x104   : > { %5772 = vmatprep.subr.bf16.mxu0 %v6291_v29 }
 0x105   : > { %v2101_v52 = vrot.slane %v2100_v43, 4 }
 0x106   : > { %5765 = vmatmul.mubr.bf16.vlgmr.msra.gmra.mrb[0].mxu0 %v6292_v34  ;;  %v2113_v34 = vrot.slane %v2111_v19, 5 }
 0x107   : > { %5773 = vmatpush3.bf16.msra.mxu0 %v6291_v29  ;;  %5768 = vmatprep.mubr.bf16.mxu0 %v6298_v35  ;;  %v2063_v29 = vrot.slane %v2061_v15, 5  ;;  %v2073_v35 = vrot.slane %v2072_v21, 4  ;;  %v2513_v15 = vshll.u32 %v6875_v6, 16 }
 0x108   : > { %5774 = vmatprep.subr.bf16.mxu0 %v6293_v36 }
 0x109   : > { %v2064_v42 = vsel %vm6566_vm2, %v2059_v28, %v2063_v29  ;;  %v6888_v27 = vrot.slane %v2513_v15, 5  ;;  %v2441_v29 = vld [vmem:[#allocation2 + $0x18] sm:$0xf] }
 0x10b   : > { %5775 = vmatpush3.bf16.msra.mxu0 %v6293_v36  ;;  %v2077_v36 = vrot.slane %v2075_v22, 5 }
 0x10c   : > { %5776 = vmatprep.subr.bf16.mxu0 %v6294_v41 }
 0x10d   : > { %v2078_v47 = vsel %vm6566_vm2, %v2073_v35, %v2077_v36 }
 0x10e   : > { %5769 = vmatmul.mubr.bf16.gmra.mrb[4].mxu0 %v6299_v44  ;;  %v2114_v44 = vor.u32 %v2113_v34, %v2110_v33  ;;  %v5025_v51 = vcombine.low %v2078_v47, %v2092_v48 }
 0x10f   : > { %5777 = vmatpush3.bf16.msra.mxu0 %v6294_v41  ;;  %5788 = vmatprep.mubr.bf16.mxu0 %v5023_v45  ;;  %v2103_v41 = vshll.u32 %v5004_v30, 16  ;;  %v2117_v45 = vshll.u32 %v5006_v39, 16  ;;  %v2444_v30 = vld [vmem:[#allocation2 + $0x1c] sm:$0x1] }
 0x110   : > { %5778 = vmatprep.subr.bf16.mxu0 %v6295_v49  ;;  %v2115_v53 = vrot.slane %v2114_v44, 4  ;;  %v2432_v44 = vld [vmem:[#allocation2 + $0xc] sm:$0x1] }
 0x111   : > { %v2105_v50 = vrot.slane %v2103_v41, 5  ;;  %v2119_v54 = vrot.slane %v2117_v45, 5 }
 0x113   : > { %5779 = vmatpush3.bf16.msra.mxu0 %v6295_v49  ;;  %v5024_v49 = vcombine.low %v2050_v40, %v2064_v42  ;;  %v2106_v55 = vsel %vm6566_vm2, %v2101_v52, %v2105_v50 }
 0x114   : > { %5780 = vmatprep.subr.bf16.mxu0 %v6296_v56 }
 0x117   : > { %5781 = vmatpush3.bf16.msra.mxu0 %v6296_v56  ;;  %v2120_v56 = vsel %vm6566_vm2, %v2115_v53, %v2119_v54  ;;  %v2447_v53 = vld [vmem:[#allocation2 + $0x20] sm:$0xf] }
 0x118   : > { %5782 = vmatprep.subr.bf16.mxu0 %v6297_v61  ;;  %v5026_v57 = vcombine.low %v2106_v55, %v2120_v56 }
 0x11b   : > { %5783 = vmatpush3.bf16.msra.mxu0 %v6297_v61  ;;  %v6304_v61 = vld [vmem:[%s7471_s6 + $0x50] sm:$0xff]  }
 0x11c   : > { %5784 = vmatprep.subr.bf16.mxu0 %v6300_v20  ;;  %5800 = vmatprep.subr.bf16.mxu1 %v6304_v61 }
 0x11d   : > { %5801 = vmatpush3.bf16.msra.mxu1 %v6304_v61 }
 0x11e   : > { %5802 = vmatprep.subr.bf16.mxu1 %v6305_v62 }
 0x11f   : > { %5785 = vmatpush3.bf16.msra.mxu0 %v6300_v20  ;;  %v6883_v20 = vld [vmem:[#allocation2 + $0x4] sm:$0x1] }
 0x120   : > { %5786 = vmatprep.subr.bf16.mxu0 %v6301_v25  ;;  %v2519_v23 = vshll.u32 %v6883_v20, 16 }
 0x121   : > { %5803 = vmatpush3.bf16.msra.mxu1 %v6305_v62 }
 0x122   : > { %5804 = vmatprep.subr.bf16.mxu1 %v6306_v63 }
 0x123   : > { %5787 = vmatpush3.bf16.msra.mxu0 %v6301_v25 }
 0x125   : > { %5805 = vmatpush3.bf16.msra.mxu1 %v6306_v63 }
 0x126   : > { %5789 = vmatmul.mubr.bf16.vlgmr.msra.gmra.mrb[0].mxu0 %v5024_v49  ;;  %5806 = vmatprep.subr.bf16.mxu1 %v6307_v0 }
 0x127   : > { %5792 = vmatprep.mubr.bf16.mxu0 %v5025_v51 }
 0x129   : > { %5807 = vmatpush3.bf16.msra.mxu1 %v6307_v0 }
 0x12a   : > { %5808 = vmatprep.subr.bf16.mxu1 %v6308_v1 }
 0x12d   : > { %5809 = vmatpush3.bf16.msra.mxu1 %v6308_v1  ;;  %v2435_v1 = vld [vmem:[#allocation2 + $0x10] sm:$0xf] }
 0x12e   : > { %5793 = vmatmul.mubr.bf16.gmra.mrb[4].mxu0 %v5026_v57  ;;  %5810 = vmatprep.subr.bf16.mxu1 %v6309_v2 }
 0x131   : > { %5811 = vmatpush3.bf16.msra.mxu1 %v6309_v2  ;;  %v2438_v2 = vld [vmem:[#allocation2 + $0x14] sm:$0x1] }
 0x132   : > { %5820 = vmatprep.subr.bf16.mxu1 %v6867_v3 }
 0x1f9   : > { %v5790_v5 = vpop.f32.mrb[0].mxu0 }
 0x1fa   : > { %v2284_v7 = vadd.f32 %v5790_v5, %v6873_v4  ;;  %v2236_v8 = vpop.f32.mrb[1].mxu0 }
 0x1fb   : > { %v2282_v9 = vadd.f32 %v6873_v4, %v2236_v8  ;;  %v5791_v10 = vpop.f32.mrb[2].mxu0 }
 0x1fc   : > { %v2292_v11 = vmax.f32 %v2284_v7, 0.0  ;;  %v2285_v12 = vadd.f32 %v5791_v10, %v6873_v4  ;;  %v2239_v13 = vpop.f32.mrb[3].mxu0 }
 0x1fd   : > { %v2290_v16 = vmax.f32 %v2282_v9, 0.0  ;;  %v2283_v17 = vadd.f32 %v6873_v4, %v2239_v13 }
 0x1fe   : > { %v5323_v18 = vpack.c.bf16 %v2292_v11, %v2292_v11  ;;  %v2293_v19 = vmax.f32 %v2285_v12, 0.0 }
 0x1ff   : > { %v5321_v21 = vpack.c.bf16 %v2290_v16, %v2290_v16  ;;  %v2291_v22 = vmax.f32 %v2283_v17, 0.0 }
 0x200   : > { %v2359_v24 = vshrl.u32 %v5323_v18, 16  ;;  %v5324_v25 = vpack.c.bf16 %v2293_v19, %v2293_v19  ;;  %v2362_v28 = vshll.u32 %v5323_v18, 16 }
 0x201   : > { %v2343_v31 = vshrl.u32 %v5321_v21, 16  ;;  %v2346_v32 = vshll.u32 %v5321_v21, 16  ;;  %v5322_v33 = vpack.c.bf16 %v2291_v22, %v2291_v22  ;;  %v5794_v34 = vpop.f32.mrb[4].mxu0  ;;  %v2465_v21 = vld [vmem:[#allocation2 + $0x38] sm:$0xf] }
 0x202   : > { %v2361_v35 = vrot.slane %v2359_v24, 7  ;;  %v2367_v38 = vshrl.u32 %v5324_v25, 16  ;;  %v2370_v39 = vshll.u32 %v5324_v25, 16  ;;  %v2288_v40 = vadd.f32 %v5794_v34, %v6873_v4  ;;  %v2252_v41 = vpop.f32.mrb[5].mxu0 }
 0x203   : > { %v2345_v43 = vrot.slane %v2343_v31, 7  ;;  %v2351_v45 = vshrl.u32 %v5322_v33, 16  ;;  %v2354_v47 = vshll.u32 %v5322_v33, 16  ;;  %v2286_v48 = vadd.f32 %v6873_v4, %v2252_v41  ;;  %v5795_v49 = vpop.f32.mrb[6].mxu0  ;;  %v2456_v33 = vld [vmem:[#allocation2 + $0x2c] sm:$0x1] }
 0x204   : > { %v2364_v50 = vor.u32 %v2362_v28, %v2361_v35  ;;  %v2365_v51 = vrot.slane %v2361_v35, 4  ;;  %v2369_v52 = vrot.slane %v2367_v38, 7  ;;  %v2296_v54 = vmax.f32 %v2288_v40, 0.0  ;;  %v2255_v55 = vpop.f32.mrb[7].mxu0 }
 0x205   : > { %v2348_v56 = vor.u32 %v2346_v32, %v2345_v43  ;;  %v2349_v57 = vrot.slane %v2345_v43, 4  ;;  %v2353_v59 = vrot.slane %v2351_v45, 7  ;;  %v2294_v60 = vmax.f32 %v2286_v48, 0.0  ;;  %v2453_v32 = vld [vmem:[#allocation2 + $0x28] sm:$0xf] }
 0x206   : > { %v2442_v61 = vsel %vm6892_vm7, %v2364_v50, %v2441_v29  ;;  %v2445_v62 = vsel %vm6899_vm8, %v2365_v51, %v2444_v30  ;;  %v2372_v63 = vor.u32 %v2370_v39, %v2369_v52  ;;  %v2373_v0 = vrot.slane %v2369_v52, 4  ;;  %v2468_v29 = vld [vmem:[#allocation2 + $0x3c] sm:$0x1]  ;;  %v2471_v50 = vld [vmem:[#allocation2 + $0x40] sm:$0xf] }
 0x207   : > { %2443 = vst [vmem:[#allocation2 + $0x18] sm:$0xf] %v2442_v61  ;;  %2446 = vst [vmem:[#allocation2 + $0x1c] sm:$0x1] %v2445_v62  ;;  %v2427_v5 = vsel %vm6892_vm7, %v2348_v56, %v2426_v37  ;;  %v2433_v7 = vsel %vm6899_vm8, %v2349_v57, %v2432_v44  ;;  %v2356_v8 = vor.u32 %v2354_v47, %v2353_v59  ;;  %v2357_v9 = vrot.slane %v2353_v59, 4 }
 0x208   : > { %2428 = vst [vmem:[#allocation2 + $0x8] sm:$0xf] %v2427_v5  ;;  %2434 = vst [vmem:[#allocation2 + $0xc] sm:$0x1] %v2433_v7  ;;  %v2448_v10 = vsel %vm6892_vm7, %v2372_v63, %v2447_v53  ;;  %v2451_v11 = vsel %vm6899_vm8, %v2373_v0, %v2450_v58  ;;  %v5327_v12 = vpack.c.bf16 %v2296_v54, %v2296_v54  ;;  %v2474_v51 = vld [vmem:[#allocation2 + $0x44] sm:$0x1] }
 0x209   : > { %v5325_v13 = vpack.c.bf16 %v2294_v60, %v2294_v60  ;;  %2449 = vst [vmem:[#allocation2 + $0x20] sm:$0xf] %v2448_v10  ;;  %2452 = vst [vmem:[#allocation2 + $0x24] sm:$0x1] %v2451_v11  ;;  %v2436_v14 = vsel %vm6892_vm7, %v2356_v8, %v2435_v1  ;;  %v2439_v15 = vsel %vm6899_vm8, %v2357_v9, %v2438_v2  ;;  %v2459_v52 = vld [vmem:[#allocation2 + $0x30] sm:$0xf] }
 0x20a   : > { %v2289_v16 = vadd.f32 %v5795_v49, %v6873_v4  ;;  %v2287_v17 = vadd.f32 %v6873_v4, %v2255_v55  ;;  %2437 = vst [vmem:[#allocation2 + $0x10] sm:$0xf] %v2436_v14  ;;  %2440 = vst [vmem:[#allocation2 + $0x14] sm:$0x1] %v2439_v15  ;;  %v2391_v18 = vshrl.u32 %v5327_v12, 16  ;;  %v2394_v28 = vshll.u32 %v5327_v12, 16 }
 0x20b   : > { %v2375_v19 = vshrl.u32 %v5325_v13, 16  ;;  %v2378_v31 = vshll.u32 %v5325_v13, 16  ;;  %v2516_v37 = vor.u32 %v6888_v27, %v6886_v26  ;;  %v6926_v4 = vrot.slane %v2519_v23, 5  ;;  %v2462_v59 = vld [vmem:[#allocation2 + $0x34] sm:$0x1] }
 0x20c   : > { %v2297_v22 = vmax.f32 %v2289_v16, 0.0  ;;  %v2295_v24 = vmax.f32 %v2287_v17, 0.0  ;;  %v2393_v25 = vrot.slane %v2391_v18, 7 }
 0x20d   : > { %v2377_v30 = vrot.slane %v2375_v19, 7  ;;  %v2517_v60 = vrot.slane %v2516_v37, 4 }
 0x20e   : > { %v5328_v34 = vpack.c.bf16 %v2297_v22, %v2297_v22  ;;  %v5326_v35 = vpack.c.bf16 %v2295_v24, %v2295_v24  ;;  %v2396_v38 = vor.u32 %v2394_v28, %v2393_v25  ;;  %v2397_v39 = vrot.slane %v2393_v25, 4  ;;  %v6947_v7 = vld [vmem:[#allocation2 + $0x18] sm:$0xf]  ;;  %v6959_v16 = vld [vmem:[#allocation2 + $0x1c] sm:$0x1] }
 0x20f   : > { %v2380_v40 = vor.u32 %v2378_v31, %v2377_v30  ;;  %v2381_v41 = vrot.slane %v2377_v30, 4  ;;  %v6928_v48 = vld [vmem:[#allocation2 + $0x8] sm:$0xf]  ;;  %v6938_v53 = vld [vmem:[#allocation2 + $0xc] sm:$0x1]  ;;  %v2522_v36 = vsel %vm6566_vm2, %v2517_v60, %v6926_v4  ;;  %v2555_v24 = vshll.u32 %v6947_v7, 16 }
 0x210   : > { %v2399_v43 = vshrl.u32 %v5328_v34, 16  ;;  %v2402_v44 = vshll.u32 %v5328_v34, 16  ;;  %v2383_v45 = vshrl.u32 %v5326_v35, 16  ;;  %v2386_v47 = vshll.u32 %v5326_v35, 16  ;;  %v6963_v22 = vld [vmem:[#allocation2 + $0x20] sm:$0xf] }
 0x211   : > { %v2466_v49 = vsel %vm6892_vm7, %v2396_v38, %v2465_v21  ;;  %v2469_v26 = vsel %vm6899_vm8, %v2397_v39, %v2468_v29  ;;  %v2454_v23 = vsel %vm6892_vm7, %v2380_v40, %v2453_v32  ;;  %v2457_v27 = vsel %vm6899_vm8, %v2381_v41, %v2456_v33  ;;  %v6942_v58 = vld [vmem:[#allocation2 + $0x10] sm:$0xf]  ;;  %v6949_v8 = vld [vmem:[#allocation2 + $0x14] sm:$0x1]  ;;  %v6976_v38 = vld [vmem:[#allocation2 + $0x24] sm:$0x1] }
 0x212   : > { %2467 = vst [vmem:[#allocation2 + $0x38] sm:$0xf] %v2466_v49  ;;  %2470 = vst [vmem:[#allocation2 + $0x3c] sm:$0x1] %v2469_v26  ;;  %v2401_v54 = vrot.slane %v2399_v43, 7  ;;  %v2385_v55 = vrot.slane %v2383_v45, 7 }
 0x213   : > { %2455 = vst [vmem:[#allocation2 + $0x28] sm:$0xf] %v2454_v23  ;;  %2458 = vst [vmem:[#allocation2 + $0x2c] sm:$0x1] %v2457_v27  ;;  %v2524_v56 = vshrl.u32 %v6928_v48, 16  ;;  %v2527_v57 = vshll.u32 %v6928_v48, 16 }
 0x214   : > { %v2533_v61 = vshll.u32 %v6938_v53, 16  ;;  %v2538_v62 = vshrl.u32 %v6942_v58, 16  ;;  %v2541_v63 = vshll.u32 %v6942_v58, 16  ;;  %v2404_v0 = vor.u32 %v2402_v44, %v2401_v54 }
 0x215   : > { %v2405_v1 = vrot.slane %v2401_v54, 4  ;;  %v2388_v2 = vor.u32 %v2386_v47, %v2385_v55  ;;  %v2389_v5 = vrot.slane %v2385_v55, 4  ;;  %v2526_v9 = vrot.slane %v2524_v56, 4  ;;  %v6311_v55 = vld [vmem:[%s7471_s6 + $0x8] sm:$0xff]  }
 0x216   : > { %v2529_v10 = vrot.slane %v2527_v57, 5  ;;  %v2540_v11 = vrot.slane %v2538_v62, 4  ;;  %v2472_v12 = vsel %vm6892_vm7, %v2404_v0, %v2471_v50  ;;  %v2543_v18 = vrot.slane %v2541_v63, 5 }
 0x217   : > { %v2475_v13 = vsel %vm6899_vm8, %v2405_v1, %v2474_v51  ;;  %v2460_v14 = vsel %vm6892_vm7, %v2388_v2, %v2459_v52  ;;  %v2463_v15 = vsel %vm6899_vm8, %v2389_v5, %v2462_v59  ;;  %2473 = vst [vmem:[#allocation2 + $0x40] sm:$0xf] %v2472_v12  ;;  %v2547_v19 = vshll.u32 %v6949_v8, 16  ;;  %v2906_v1 = vld [vmem:[#allocation2 + $0x10] sm:$0xe] }
 0x218   : > { %2476 = vst [vmem:[#allocation2 + $0x44] sm:$0x1] %v2475_v13  ;;  %2461 = vst [vmem:[#allocation2 + $0x30] sm:$0xf] %v2460_v14  ;;  %v2530_v17 = vor.u32 %v2529_v10, %v2526_v9  ;;  %v2552_v21 = vshrl.u32 %v6947_v7, 16  ;;  %v2535_v42 = vrot.slane %v2533_v61, 5  ;;  %v2544_v28 = vor.u32 %v2543_v18, %v2540_v11 }
 0x219   : > { %2464 = vst [vmem:[#allocation2 + $0x34] sm:$0x1] %v2463_v15  ;;  %v2561_v30 = vshll.u32 %v6959_v16, 16  ;;  %v2557_v32 = vrot.slane %v2555_v24, 5  ;;  %v2566_v33 = vshrl.u32 %v6963_v22, 16  ;;  %v2569_v34 = vshll.u32 %v6963_v22, 16 }
 0x21a   : > { %v2531_v25 = vrot.slane %v2530_v17, 4  ;;  %v2554_v29 = vrot.slane %v2552_v21, 4  ;;  %v6970_v31 = vld [vmem:[#allocation2 + $0x28] sm:$0xf]  ;;  %v2545_v37 = vrot.slane %v2544_v28, 4  ;;  %v2549_v4 = vrot.slane %v2547_v19, 5 }
 0x21b   : > { %v2580_v39 = vshrl.u32 %v6970_v31, 16  ;;  %v6979_v43 = vld [vmem:[#allocation2 + $0x2c] sm:$0x1]  ;;  %v2568_v44 = vrot.slane %v2566_v33, 4  ;;  %v2571_v45 = vrot.slane %v2569_v34, 5  ;;  %v2563_v47 = vrot.slane %v2561_v30, 5 }
 0x21c   : > { %v2536_v35 = vsel %vm6566_vm2, %v2531_v25, %v2535_v42  ;;  %v2558_v41 = vor.u32 %v2557_v32, %v2554_v29  ;;  %v2583_v26 = vshll.u32 %v6970_v31, 16  ;;  %v6982_v23 = vld [vmem:[#allocation2 + $0x38] sm:$0xf]  ;;  %v2550_v27 = vsel %vm6566_vm2, %v2545_v37, %v2549_v4  ;;  %v2508_v9 = vld [vmem:[#allocation2 + $0x3c] sm:$0x1]  ;;  %v6312_v29 = vld [vmem:[%s7471_s6 + $0x10] sm:$0xff]  }
 0x21d   : > { %v5060_v40 = vcombine.low %v2522_v36, %v2536_v35  ;;  %v2582_v49 = vrot.slane %v2580_v39, 4  ;;  %v2572_v51 = vor.u32 %v2571_v45, %v2568_v44  ;;  %v2575_v52 = vshll.u32 %v6976_v38, 16  ;;  %v2907_v12 = vld [vmem:[#allocation2 + $0x18] sm:$0xe] }
 0x21e   : > { %v2559_v50 = vrot.slane %v2558_v41, 4  ;;  %v2585_v56 = vrot.slane %v2583_v26, 5  ;;  %v2589_v57 = vshll.u32 %v6979_v43, 16  ;;  %v2608_v0 = vshrl.u32 %v6982_v23, 16  ;;  %v2911_v39 = vld [vmem:[#allocation2 + $0x38] sm:$0xe] }
 0x21f   : > { %5812 = vmatprep.mubr.bf16.mxu1 %v5060_v40  ;;  %v6987_v54 = vld [vmem:[#allocation2 + $0x30] sm:$0xf]  ;;  %v2573_v63 = vrot.slane %v2572_v51, 4  ;;  %v2941_v13 = vrot.slane %v6949_v8, 5  ;;  %v2611_v17 = vshll.u32 %v6982_v23, 16  ;;  %v2577_v18 = vrot.slane %v2575_v52, 5 }
 0x220   : > { %v2507_v59 = vld [vmem:[#allocation2 + $0x34] sm:$0x1]  ;;  %v2594_v60 = vshrl.u32 %v6987_v54, 16  ;;  %v2597_v61 = vshll.u32 %v6987_v54, 16  ;;  %v2564_v62 = vsel %vm6566_vm2, %v2559_v50, %v2563_v47  ;;  %v2586_v5 = vor.u32 %v2585_v56, %v2582_v49  ;;  %v2910_v37 = vld [vmem:[#allocation2 + $0x30] sm:$0xe] }
 0x221   : > { %v5061_v2 = vcombine.low %v2550_v27, %v2564_v62  ;;  %v2603_v14 = vshll.u32 %v2507_v59, 16  ;;  %v2610_v15 = vrot.slane %v2608_v0, 4  ;;  %v2591_v21 = vrot.slane %v2589_v57, 5  ;;  %v6314_v47 = vld [vmem:[%s7471_s6 + $0x18] sm:$0xff]   ;;  %v2904_v0 = vld [vmem:[#allocation2] sm:$0xe] }
 0x222   : > { %v2596_v10 = vrot.slane %v2594_v60, 4  ;;  %v2599_v11 = vrot.slane %v2597_v61, 5  ;;  %v2587_v19 = vrot.slane %v2586_v5, 4  ;;  %v2945_v42 = vrot.slane %v6959_v16, 5  ;;  %v6318_v62 = vld [vmem:[%s7471_s6 + $0x38] sm:$0xff]   ;;  %v6322_v5 = vld [vmem:[%s7471_s6 + $0x88] sm:$0xff]  }
 0x223   : > { %5813 = vmatmul.mubr.bf16.vlgmr.msra.gmra.mrb[0].mxu1 %v5061_v2  ;;  %v2613_v24 = vrot.slane %v2611_v17, 5  ;;  %v2617_v25 = vshll.u32 %v2508_v9, 16  ;;  %v2578_v28 = vsel %vm6566_vm2, %v2573_v63, %v2577_v18  ;;  %v2605_v33 = vrot.slane %v2603_v14, 5  ;;  %v6320_v63 = vld [vmem:[%s7471_s6 + $0x80] sm:$0xff]   ;;  %v6329_v17 = vld [vmem:[%s7471_s6 + $0xb8] sm:$0xff]  }
 0x224   : > { %v2600_v36 = vor.u32 %v2599_v11, %v2596_v10  ;;  %5821 = vmatpush3.bf16.msra.mxu1 %v6867_v3  ;;  %v2592_v8 = vsel %vm6566_vm2, %v2587_v19, %v2591_v21  ;;  %v5086_v3 = vrot.slane %v2906_v1, 9  ;;  %v5087_v35 = vrot.slane %v2907_v12, 9  ;;  %v2905_v1 = vld [vmem:[#allocation2 + $0x8] sm:$0xe]  ;;  %v6326_v14 = vld [vmem:[%s7471_s6 + $0xa0] sm:$0xff]  }
 0x225   : > { %5822 = vmatprep.subr.bf16.mxu1 %v6311_v55  ;;  %v5062_v32 = vcombine.low %v2578_v28, %v2592_v8  ;;  %v2614_v34 = vor.u32 %v2613_v24, %v2610_v15  ;;  %v2619_v44 = vrot.slane %v2617_v25, 5  ;;  %v5090_v26 = vrot.slane %v2910_v37, 9  ;;  %v2909_v15 = vld [vmem:[#allocation2 + $0x28] sm:$0xe]  ;;  %v2908_v18 = vld [vmem:[#allocation2 + $0x20] sm:$0xe] }
 0x226   : > { %v2601_v30 = vrot.slane %v2600_v36, 4  ;;  %v7017_v4 = vsel %vm7011_vm11, %v5086_v3, %v2941_v13  ;;  %v7023_v45 = vsel %vm7011_vm11, %v5087_v35, %v2945_v42  ;;  %v2957_v27 = vrot.slane %v2507_v59, 5  ;;  %v6315_v59 = vld [vmem:[%s7471_s6 + $0x20] sm:$0xff]   ;;  %v3287_v35 = vld [vmem:[#allocation2 + $0x8] sm:$0xf] }
 0x227   : > { %5816 = vmatprep.mubr.bf16.mxu1 %v5062_v32  ;;  %v2615_v41 = vrot.slane %v2614_v34, 4  ;;  %v5109_v49 = vcombine.low %v7017_v4, %v7023_v45  ;;  %v5091_v51 = vrot.slane %v2911_v39, 9  ;;  %v2961_v52 = vrot.slane %v2508_v9, 5  ;;  %v6330_v36 = vld [vmem:[%s7471_s6 + $0xc0] sm:$0xff]   ;;  %v6336_v32 = vld [vmem:[%s7471_s6 + $0xe8] sm:$0xff]   ;;  %v6337_v34 = vld [vmem:[%s7471_s6 + $0xf0] sm:$0xff]  }
 0x228   : > { %5823 = vmatpush3.bf16.msra.mxu1 %v6311_v55  ;;  %v2606_v40 = vsel %vm6566_vm2, %v2601_v30, %v2605_v33  ;;  %v7034_v56 = vsel %vm7011_vm11, %v5090_v26, %v2957_v27  ;;  %v5072_v57 = vcombine.low %v6875_v6, %v6928_v48  ;;  %v6316_v6 = vld [vmem:[%s7471_s6 + $0x28] sm:$0xff]   ;;  %v6317_v48 = vld [vmem:[%s7471_s6 + $0x30] sm:$0xff]   ;;  %v5073_v2 = vcombine.low %v6942_v58, %v6947_v7  ;;  %v6335_v3 = vld [vmem:[%s7471_s6 + $0xe0] sm:$0xff]  }
 0x229   : > { %5824 = vmatprep.subr.bf16.mxu1 %v6312_v29  ;;  %v2620_v50 = vsel %vm6566_vm2, %v2615_v41, %v2619_v44  ;;  %v7040_v60 = vsel %vm7011_vm11, %v5091_v51, %v2961_v52  ;;  %v5074_v9 = vcombine.low %v6963_v22, %v6970_v31  ;;  %v2933_v10 = vrot.slane %v6883_v20, 5  ;;  %v6324_v58 = vld [vmem:[%s7471_s6 + $0x90] sm:$0xff]   ;;  %v6338_v39 = vld [vmem:[%s7471_s6 + $0xf8] sm:$0xff]   ;;  %v7133_v51 = vld [vmem:[#allocation2 + $0xc] sm:$0x1] }
 0x22a   : > { %v5063_v55 = vcombine.low %v2606_v40, %v2620_v50  ;;  %v5111_v61 = vcombine.low %v7034_v56, %v7040_v60  ;;  %v2937_v11 = vrot.slane %v6938_v53, 5  ;;  %v5084_v12 = vrot.slane %v2904_v0, 9  ;;  %v6325_v53 = vld [vmem:[%s7471_s6 + $0x98] sm:$0xff]   ;;  %v6333_v30 = vld [vmem:[#allocation2 + $0x8] ss:$8 sps:$4 sm:$0xff]  }
 0x22b   : > { %v5085_v13 = vrot.slane %v2905_v1, 9  ;;  %v5075_v20 = vcombine.low %v6987_v54, %v6982_v23  ;;  %v6327_v23 = vld [vmem:[%s7471_s6 + $0xa8] sm:$0xff]   ;;  %v6328_v54 = vld [vmem:[%s7471_s6 + $0xb0] sm:$0xff]   ;;  %v5089_v19 = vrot.slane %v2909_v15, 9  ;;  %v2953_v21 = vrot.slane %v6979_v43, 5 }
 0x22c   : > { %5825 = vmatpush3.bf16.msra.mxu1 %v6312_v29  ;;  %v2934_v7 = vsel %vm7011_vm11, %v5084_v12, %v2933_v10  ;;  %v5088_v42 = vrot.slane %v2908_v18, 9  ;;  %v2949_v24 = vrot.slane %v6976_v38, 5  ;;  %v6331_v43 = vld [vmem:[%s7471_s6 + $0xc8] sm:$0xff]   ;;  %v6332_v38 = vld [vmem:[%s7471_s6 + $0xd0] sm:$0xff]   ;;  %v6334_v29 = vld [vmem:[%s7471_s6 + $0xd8] sm:$0xff]   ;;  %v3304_v40 = vshrl.u32 %v3287_v35, 16 }
 0x22d   : > { %5817 = vmatmul.mubr.bf16.gmra.mrb[4].mxu1 %v5063_v55  ;;  %5826 = vmatprep.subr.bf16.mxu1 %v6314_v47  ;;  %v2938_v22 = vsel %vm7011_vm11, %v5085_v13, %v2937_v11  ;;  %v2954_v25 = vsel %vm7011_vm11, %v5089_v19, %v2953_v21  ;;  %v3289_v33 = vld [vmem:[#allocation2 + $0x10] sm:$0xf]  ;;  %v3307_v41 = vshll.u32 %v3287_v35, 16  ;;  %v7131_v27 = vld [vmem:[#allocation2 + $0x14] sm:$0x1]  ;;  %v6342_v55 = vld [vmem:[%s7471_s6 + $0x108] sm:$0xff]  }
 0x22e   : > { %5836 = vmatprep.mubr.bf16.mxu1 %v5072_v57  ;;  %v5108_v31 = vcombine.low %v2934_v7, %v2938_v22  ;;  %v2950_v28 = vsel %vm7011_vm11, %v5088_v42, %v2949_v24  ;;  %v3318_v37 = vshrl.u32 %v3289_v33, 16  ;;  %v3321_v4 = vshll.u32 %v3289_v33, 16  ;;  %v6339_v52 = vld [vmem:[#allocation2 + $0x18] ss:$8 sps:$4 sm:$0xff]   ;;  %v6341_v60 = vld [vmem:[#allocation2 + $0x28] ss:$8 sps:$4 sm:$0xff]  }
 0x22f   : > { %v5110_v8 = vcombine.low %v2950_v28, %v2954_v25  ;;  %v3309_v26 = vrot.slane %v3307_v41, 5  ;;  %v3327_v57 = vshll.u32 %v7131_v27, 16  ;;  %v6345_v10 = vld [vmem:[%s7471_s6 + $0x118] sm:$0xff]   ;;  %v3293_v12 = vld [vmem:[#allocation2 + $0x20] sm:$0xf]  ;;  %v6347_v18 = vld [vmem:[%s7471_s6 + $0x128] sm:$0xff]  }
 0x230   : > { %5827 = vmatpush3.bf16.msra.mxu1 %v6314_v47  ;;  %v3320_v44 = vrot.slane %v3318_v37, 4  ;;  %v3323_v45 = vrot.slane %v3321_v4, 5  ;;  %v6340_v47 = vld [vmem:[%s7471_s6 + $0x100] sm:$0xff]   ;;  %v3297_v13 = vld [vmem:[#allocation2 + $0x30] sm:$0xf] }
 0x231   : > { %5828 = vmatprep.subr.bf16.mxu1 %v6315_v59  ;;  %v6346_v7 = vld [vmem:[%s7471_s6 + $0x120] sm:$0xff]   ;;  %v3291_v22 = vld [vmem:[#allocation2 + $0x18] sm:$0xf]  ;;  %v7194_v35 = vld [vmem:[#allocation2 + $0x34] sm:$0x1] }
 0x232   : > { %v3324_v50 = vor.u32 %v3323_v45, %v3320_v44  ;;  %v3335_v15 = vshll.u32 %v3291_v22, 16  ;;  %v3301_v28 = vld [vmem:[#allocation2 + $0x40] sm:$0xf]  ;;  %v3299_v33 = vld [vmem:[#allocation2 + $0x38] sm:$0xf] }
 0x233   : > { %v3402_v37 = vshrl.u32 %v3301_v28, 16  ;;  %v3405_v4 = vshll.u32 %v3301_v28, 16  ;;  %v7201_v45 = vld [vmem:[#allocation2 + $0x2c] sm:$0x1]  ;;  %v3569_v28 = vld [vmem:[#allocation2 + $0x8] sm:$0xe] }
 0x234   : > { %5829 = vmatpush3.bf16.msra.mxu1 %v6315_v59  ;;  %v3313_v59 = vshll.u32 %v7133_v51, 16  ;;  %v6397_v16 = vld [vmem:[%s6563_s12 + $0x30] ss:$8 sps:$4 sm:$0xff]  }
 0x235   : > { %5830 = vmatprep.subr.bf16.mxu1 %v6316_v6 }
 0x236   : > { %v3315_v0 = vrot.slane %v3313_v59, 5  ;;  %v3407_v59 = vrot.slane %v3405_v4, 5  ;;  %v3595_v4 = vrot.slane %v7133_v51, 5  ;;  %v6353_v51 = vld [vmem:[%s7471_s6 + $0x158] sm:$0xff]  }
 0x238   : > { %5831 = vmatpush3.bf16.msra.mxu1 %v6316_v6  ;;  %v7143_v6 = vld [vmem:[%s7473_s8] sm:$0xff]  }
 0x239   : > { %5832 = vmatprep.subr.bf16.mxu1 %v6317_v48  ;;  %6012 = vmatprep.subr.bf16.mxu0 %v7143_v6 }
 0x23a   : > { %6013 = vmatpush3.bf16.msra.mxu0 %v7143_v6 }
 0x23c   : > { %5833 = vmatpush3.bf16.msra.mxu1 %v6317_v48  ;;  %v6344_v48 = vld [vmem:[%s7471_s6 + $0x110] sm:$0xff]  }
 0x23d   : > { %5834 = vmatprep.subr.bf16.mxu1 %v6318_v62 }
 0x240   : > { %5835 = vmatpush3.bf16.msra.mxu1 %v6318_v62 }
 0x241   : > { %5844 = vmatprep.subr.bf16.mxu1 %v6320_v63 }
 0x243   : > { %5837 = vmatmul.mubr.bf16.vlgmr.msra.gmra.mrb[0].mxu1 %v5073_v2  ;;  %v7155_v2 = vld [vmem:[%s7473_s8 + $0x8] sm:$0xff]  }
 0x244   : > { %5840 = vmatprep.mubr.bf16.mxu1 %v5074_v9  ;;  %5845 = vmatpush3.bf16.msra.mxu1 %v6320_v63  ;;  %v3329_v63 = vrot.slane %v3327_v57, 5 }
 0x245   : > { %5846 = vmatprep.subr.bf16.mxu1 %v6322_v5  ;;  %6014 = vmatprep.subr.bf16.mxu0 %v7155_v2 }
 0x246   : > { %6015 = vmatpush3.bf16.msra.mxu0 %v7155_v2 }
 0x248   : > { %5847 = vmatpush3.bf16.msra.mxu1 %v6322_v5  ;;  %v6343_v5 = vld [vmem:[#allocation2 + $0x38] ss:$8 sps:$4 sm:$0xff]  }
 0x249   : > { %5848 = vmatprep.subr.bf16.mxu1 %v6324_v58 }
 0x24b   : > { %5841 = vmatmul.mubr.bf16.gmra.mrb[4].mxu1 %v5075_v20  ;;  %v3346_v20 = vshrl.u32 %v3293_v12, 16 }
 0x24c   : > { %5849 = vmatpush3.bf16.msra.mxu1 %v6324_v58  ;;  %5860 = vmatprep.mubr.bf16.mxu1 %v5108_v31  ;;  %v7167_v58 = vld [vmem:[%s7473_s8 + $0x10] sm:$0xff]   ;;  %v3295_v31 = vld [vmem:[#allocation2 + $0x28] sm:$0xf] }
 0x24d   : > { %5850 = vmatprep.subr.bf16.mxu1 %v6325_v53  ;;  %6016 = vmatprep.subr.bf16.mxu0 %v7167_v58  ;;  %v3360_v19 = vshrl.u32 %v3295_v31, 16  ;;  %v3363_v21 = vshll.u32 %v3295_v31, 16  ;;  %v7231_v31 = vld [vmem:[#allocation2 + $0x3c] sm:$0x1] }
 0x24e   : > { %6017 = vmatpush3.bf16.msra.mxu0 %v7167_v58 }
 0x250   : > { %5851 = vmatpush3.bf16.msra.mxu1 %v6325_v53  ;;  %v3349_v53 = vshll.u32 %v3293_v12, 16  ;;  %v7224_v12 = vld [vmem:[#allocation2 + $0x44] sm:$0x1] }
 0x251   : > { %5852 = vmatprep.subr.bf16.mxu1 %v6326_v14 }
 0x252   : > { %v3351_v42 = vrot.slane %v3349_v53, 5 }
 0x254   : > { %5853 = vmatpush3.bf16.msra.mxu1 %v6326_v14  ;;  %v3374_v14 = vshrl.u32 %v3297_v13, 16 }
 0x255   : > { %5854 = vmatprep.subr.bf16.mxu1 %v6327_v23 }
 0x256   : > { %v3376_v24 = vrot.slane %v3374_v14, 4 }
 0x258   : > { %5855 = vmatpush3.bf16.msra.mxu1 %v6327_v23  ;;  %v3377_v23 = vshll.u32 %v3297_v13, 16 }
 0x259   : > { %5856 = vmatprep.subr.bf16.mxu1 %v6328_v54 }
 0x25a   : > { %v3379_v25 = vrot.slane %v3377_v23, 5 }
 0x25c   : > { %5857 = vmatpush3.bf16.msra.mxu1 %v6328_v54  ;;  %v3332_v54 = vshrl.u32 %v3291_v22, 16 }
 0x25d   : > { %5858 = vmatprep.subr.bf16.mxu1 %v6329_v17 }
 0x260   : > { %5859 = vmatpush3.bf16.msra.mxu1 %v6329_v17  ;;  %v7177_v17 = vld [vmem:[%s7473_s8 + $0x18] sm:$0xff]  }
 0x261   : > { %5868 = vmatprep.subr.bf16.mxu1 %v6330_v36  ;;  %6018 = vmatprep.subr.bf16.mxu0 %v7177_v17 }
 0x262   : > { %6019 = vmatpush3.bf16.msra.mxu0 %v7177_v17 }
 0x263   : > { %5861 = vmatmul.mubr.bf16.vlgmr.msra.gmra.mrb[0].mxu1 %v5109_v49  ;;  %v3306_v49 = vrot.slane %v3304_v40, 4  ;;  %v3380_v40 = vor.u32 %v3379_v25, %v3376_v24  ;;  %v3397_v24 = vshll.u32 %v7231_v31, 16 }
 0x264   : > { %5864 = vmatprep.mubr.bf16.mxu1 %v5110_v8  ;;  %5869 = vmatpush3.bf16.msra.mxu1 %v6330_v36  ;;  %v3348_v36 = vrot.slane %v3346_v20, 4  ;;  %v3334_v8 = vrot.slane %v3332_v54, 4  ;;  %v3411_v54 = vshll.u32 %v7224_v12, 16 }
 0x265   : > { %5870 = vmatprep.subr.bf16.mxu1 %v6331_v43  ;;  %v3310_v56 = vor.u32 %v3309_v26, %v3306_v49  ;;  %v3391_v49 = vshll.u32 %v3299_v33, 16  ;;  %v7206_v26 = vld [vmem:[%s7473_s8 + $0x28] sm:$0xff]  }
 0x267   : > { %v3311_v62 = vrot.slane %v3310_v56, 4 }
 0x268   : > { %5871 = vmatpush3.bf16.msra.mxu1 %v6331_v43  ;;  %v6348_v43 = vld [vmem:[%s7471_s6 + $0x130] sm:$0xff]  }
 0x269   : > { %5872 = vmatprep.subr.bf16.mxu1 %v6332_v38  ;;  %v3316_v9 = vsel %vm6566_vm2, %v3311_v62, %v3315_v0 }
 0x26b   : > { %5865 = vmatmul.mubr.bf16.gmra.mrb[4].mxu1 %v5111_v61  ;;  %v3325_v61 = vrot.slane %v3324_v50, 4  ;;  %v6349_v50 = vld [vmem:[%s7471_s6 + $0x138] sm:$0xff]  }
 0x26c   : > { %5873 = vmatpush3.bf16.msra.mxu1 %v6332_v38  ;;  %5884 = vmatprep.mubr.bf16.mxu1 %v6333_v30  ;;  %v3337_v38 = vrot.slane %v3335_v15, 5  ;;  %v7192_v30 = vld [vmem:[#allocation2 + $0x24] sm:$0x1]  ;;  %v3570_v15 = vld [vmem:[#allocation2 + $0x10] sm:$0xe] }
 0x26d   : > { %5874 = vmatprep.subr.bf16.mxu1 %v6334_v29  ;;  %v3330_v1 = vsel %vm6566_vm2, %v3325_v61, %v3329_v63  ;;  %v3355_v44 = vshll.u32 %v7192_v30, 16  ;;  %v3369_v61 = vshll.u32 %v7201_v45, 16 }
 0x26e   : > { %v5164_v11 = vcombine.low %v3316_v9, %v3330_v1  ;;  %v3338_v41 = vor.u32 %v3337_v38, %v3334_v8  ;;  %v3393_v1 = vrot.slane %v3391_v49, 5  ;;  %v6350_v9 = vld [vmem:[%s7471_s6 + $0x140] sm:$0xff]   ;;  %v3599_v8 = vrot.slane %v7131_v27, 5 }
 0x26f   : > { %v3357_v63 = vrot.slane %v3355_v44, 5  ;;  %v3371_v20 = vrot.slane %v3369_v61, 5  ;;  %v3571_v61 = vld [vmem:[#allocation2 + $0x18] sm:$0xe] }
 0x270   : > { %5875 = vmatpush3.bf16.msra.mxu1 %v6334_v29  ;;  %v7190_v29 = vld [vmem:[%s7473_s8 + $0x20] sm:$0xff]   ;;  %v3339_v62 = vrot.slane %v3338_v41, 4 }
 0x271   : > { %5876 = vmatprep.subr.bf16.mxu1 %v6335_v3  ;;  %6020 = vmatprep.subr.bf16.mxu0 %v7190_v29 }
 0x272   : > { %6021 = vmatpush3.bf16.msra.mxu0 %v7190_v29 }
 0x273   : > { %6022 = vmatprep.subr.bf16.mxu0 %v7206_v26 }
 0x274   : > { %5877 = vmatpush3.bf16.msra.mxu1 %v6335_v3  ;;  %v3362_v3 = vrot.slane %v3360_v19, 4 }
 0x275   : > { %5878 = vmatprep.subr.bf16.mxu1 %v6336_v32 }
 0x276   : > { %6023 = vmatpush3.bf16.msra.mxu0 %v7206_v26 }
 0x278   : > { %5879 = vmatpush3.bf16.msra.mxu1 %v6336_v32  ;;  %v3365_v32 = vrot.slane %v3363_v21, 5 }
 0x279   : > { %5880 = vmatprep.subr.bf16.mxu1 %v6337_v34 }
 0x27c   : > { %5881 = vmatpush3.bf16.msra.mxu1 %v6337_v34  ;;  %v3352_v34 = vor.u32 %v3351_v42, %v3348_v36  ;;  %v6351_v36 = vld [vmem:[%s7471_s6 + $0x148] sm:$0xff]  }
 0x27d   : > { %5882 = vmatprep.subr.bf16.mxu1 %v6338_v39 }
 0x27e   : > { %v3353_v57 = vrot.slane %v3352_v34, 4  ;;  %v6352_v34 = vld [vmem:[%s7471_s6 + $0x150] sm:$0xff]  }
 0x280   : > { %5883 = vmatpush3.bf16.msra.mxu1 %v6338_v39  ;;  %v7197_v39 = vld [vmem:[#allocation2 + $0x1c] sm:$0x1] }
 0x281   : > { %5892 = vmatprep.subr.bf16.mxu1 %v6340_v47  ;;  %v3341_v56 = vshll.u32 %v7197_v39, 16 }
 0x283   : > { %5885 = vmatmul.mubr.bf16.vlgmr.msra.gmra.mrb[0].mxu1 %v6339_v52  ;;  %v3366_v52 = vor.u32 %v3365_v32, %v3362_v3  ;;  %v3343_v13 = vrot.slane %v3341_v56, 5  ;;  %v3413_v3 = vrot.slane %v3411_v54, 5  ;;  %v6394_v32 = vld [vmem:[%s6563_s12] ss:$8 sps:$4 sm:$0xff]   ;;  %v6356_v56 = vld [vmem:[%s7471_s6 + $0x170] sm:$0xff]  }
 0x284   : > { %5888 = vmatprep.mubr.bf16.mxu1 %v6341_v60  ;;  %5893 = vmatpush3.bf16.msra.mxu1 %v6340_v47  ;;  %v3388_v47 = vshrl.u32 %v3299_v33, 16  ;;  %v3404_v60 = vrot.slane %v3402_v37, 4  ;;  %v6395_v33 = vld [vmem:[%s6563_s12 + $0x10] ss:$8 sps:$4 sm:$0xff]   ;;  %v5176_v37 = vrot.slane %v3569_v28, 9 }
 0x285   : > { %5894 = vmatprep.subr.bf16.mxu1 %v6342_v55  ;;  %v3344_v14 = vsel %vm6566_vm2, %v3339_v62, %v3343_v13  ;;  %6028 = vmatprep.mubr.bf16.mxu0 %v6394_v32  ;;  %v3607_v62 = vrot.slane %v7192_v30, 5  ;;  %v6361_v28 = vld [vmem:[#allocation2 + $0x10] ss:$8 sps:$4 sm:$0xff]  }
 0x286   : > { %v3390_v0 = vrot.slane %v3388_v47, 4  ;;  %v3408_v22 = vor.u32 %v3407_v59, %v3404_v60  ;;  %v3596_v49 = vsel %vm7011_vm11, %v5176_v37, %v3595_v4  ;;  %v3574_v60 = vld [vmem:[#allocation2 + $0x30] sm:$0xe]  ;;  %v6357_v59 = vld [vmem:[%s7471_s6 + $0x178] sm:$0xff]  }
 0x288   : > { %5895 = vmatpush3.bf16.msra.mxu1 %v6342_v55  ;;  %v3383_v55 = vshll.u32 %v7194_v35, 16  ;;  %v3394_v23 = vor.u32 %v3393_v1, %v3390_v0  ;;  %v3409_v25 = vrot.slane %v3408_v22, 4  ;;  %v5181_v0 = vrot.slane %v3574_v60, 9  ;;  %v6369_v60 = vld [vmem:[#allocation2 + $0x30] ss:$8 sps:$4 sm:$0xff]  }
 0x289   : > { %5896 = vmatprep.subr.bf16.mxu1 %v6344_v48  ;;  %v3615_v1 = vrot.slane %v7194_v35, 5 }
 0x28a   : > { %v3395_v38 = vrot.slane %v3394_v23, 4  ;;  %v3414_v27 = vsel %vm6566_vm2, %v3409_v25, %v3413_v3  ;;  %v3952_v3 = vld [vmem:[#allocation2 + $0x18] sm:$0xf] }
 0x28b   : > { %5889 = vmatmul.mubr.bf16.gmra.mrb[4].mxu1 %v6343_v5  ;;  %v7219_v5 = vld [vmem:[%s7473_s8 + $0x30] sm:$0xff]   ;;  %v3616_v30 = vsel %vm7011_vm11, %v5181_v0, %v3615_v1  ;;  %v3981_v37 = vshrl.u32 %v3952_v3, 16  ;;  %v3984_v4 = vshll.u32 %v3952_v3, 16  ;;  %v7353_v3 = vld [vmem:[#allocation2 + $0x2c] sm:$0x1] }
 0x28c   : > { %5897 = vmatpush3.bf16.msra.mxu1 %v6344_v48  ;;  %5908 = vmatprep.mubr.bf16.mxu1 %v5164_v11  ;;  %v3381_v48 = vrot.slane %v3380_v40, 4  ;;  %v3385_v11 = vrot.slane %v3383_v55, 5  ;;  %v3399_v40 = vrot.slane %v3397_v24, 5  ;;  %v6355_v55 = vld [vmem:[%s7471_s6 + $0x168] sm:$0xff]  }
 0x28d   : > { %5898 = vmatprep.subr.bf16.mxu1 %v6345_v10  ;;  %6024 = vmatprep.subr.bf16.mxu0 %v7219_v5 }
 0x28e   : > { %v3386_v53 = vsel %vm6566_vm2, %v3381_v48, %v3385_v11  ;;  %6025 = vmatpush3.bf16.msra.mxu0 %v7219_v5  ;;  %v3400_v44 = vsel %vm6566_vm2, %v3395_v38, %v3399_v40  ;;  %v6358_v11 = vld [vmem:[%s7471_s6 + $0x180] sm:$0xff]   ;;  %v6365_v38 = vld [vmem:[%s7471_s6 + $0x1b0] sm:$0xff]  }
 0x28f   : > { %v5167_v47 = vcombine.low %v3400_v44, %v3414_v27  ;;  %v3983_v44 = vrot.slane %v3981_v37, 4 }
 0x290   : > { %5899 = vmatpush3.bf16.msra.mxu1 %v6345_v10  ;;  %v3367_v10 = vrot.slane %v3366_v52, 4  ;;  %v6354_v52 = vld [vmem:[%s7471_s6 + $0x160] sm:$0xff]  }
 0x291   : > { %5900 = vmatprep.subr.bf16.mxu1 %v6346_v7 }
 0x292   : > { %v3372_v21 = vsel %vm6566_vm2, %v3367_v10, %v3371_v20  ;;  %v3603_v10 = vrot.slane %v7197_v39, 5  ;;  %v3576_v20 = vld [vmem:[#allocation2 + $0x40] sm:$0xe] }
 0x293   : > { %v5166_v42 = vcombine.low %v3372_v21, %v3386_v53  ;;  %v5183_v54 = vrot.slane %v3576_v20, 9  ;;  %v3619_v21 = vrot.slane %v7231_v31, 5  ;;  %v6363_v31 = vld [vmem:[%s7471_s6 + $0x1a0] sm:$0xff]  }
 0x294   : > { %5901 = vmatpush3.bf16.msra.mxu1 %v6346_v7  ;;  %v3358_v7 = vsel %vm6566_vm2, %v3353_v57, %v3357_v63  ;;  %v3572_v57 = vld [vmem:[#allocation2 + $0x20] sm:$0xe]  ;;  %v3573_v63 = vld [vmem:[#allocation2 + $0x28] sm:$0xe] }
 0x295   : > { %5902 = vmatprep.subr.bf16.mxu1 %v6347_v18  ;;  %v5165_v19 = vcombine.low %v3344_v14, %v3358_v7  ;;  %v5179_v48 = vrot.slane %v3572_v57, 9  ;;  %v5180_v13 = vrot.slane %v3573_v63, 9  ;;  %v3611_v7 = vrot.slane %v7201_v45, 5  ;;  %v6359_v45 = vld [vmem:[%s7471_s6 + $0x188] sm:$0xff]   ;;  %v3575_v14 = vld [vmem:[#allocation2 + $0x38] sm:$0xe] }
 0x296   : > { %v3954_v20 = vld [vmem:[#allocation2 + $0x20] sm:$0xf] }
 0x297   : > { %v3608_v22 = vsel %vm7011_vm11, %v5179_v48, %v3607_v62  ;;  %v3612_v53 = vsel %vm7011_vm11, %v5180_v13, %v3611_v7  ;;  %v6372_v48 = vld [vmem:[%s7471_s6 + $0x1d0] sm:$0xff]   ;;  %v3956_v7 = vld [vmem:[#allocation2 + $0x28] sm:$0xf] }
 0x298   : > { %5903 = vmatpush3.bf16.msra.mxu1 %v6347_v18  ;;  %v7240_v18 = vld [vmem:[%s7473_s8 + $0x38] sm:$0xff]   ;;  %v5202_v23 = vcombine.low %v3612_v53, %v3616_v30  ;;  %v6374_v30 = vld [vmem:[%s7471_s6 + $0x1e0] sm:$0xff]  }
 0x299   : > { %5904 = vmatprep.subr.bf16.mxu1 %v6348_v43  ;;  %6026 = vmatprep.subr.bf16.mxu0 %v7240_v18  ;;  %v3960_v53 = vld [vmem:[#allocation2 + $0x38] sm:$0xf] }
 0x29a   : > { %6027 = vmatpush3.bf16.msra.mxu0 %v7240_v18 }
 0x29c   : > { %5905 = vmatpush3.bf16.msra.mxu1 %v6348_v43  ;;  %v5177_v43 = vrot.slane %v3570_v15, 9  ;;  %v3623_v15 = vrot.slane %v7224_v12, 5  ;;  %v6362_v12 = vld [vmem:[%s7471_s6 + $0x198] sm:$0xff]  }
 0x29d   : > { %5906 = vmatprep.subr.bf16.mxu1 %v6349_v50  ;;  %6029 = vmatmul.mubr.bf16.vlgmr.msra.gmra.mrb[8].mxu0 %v6395_v33 }
 0x29e   : > { %v3600_v41 = vsel %vm7011_vm11, %v5177_v43, %v3599_v8  ;;  %v6364_v43 = vld [vmem:[%s7471_s6 + $0x1a8] sm:$0xff]   ;;  %v3950_v8 = vld [vmem:[#allocation2 + $0x10] sm:$0xf] }
 0x29f   : > { %v3967_v32 = vshrl.u32 %v3950_v8, 16  ;;  %v3970_v33 = vshll.u32 %v3950_v8, 16 }
 0x2a0   : > { %5907 = vmatpush3.bf16.msra.mxu1 %v6349_v50  ;;  %v5200_v50 = vcombine.low %v3596_v49, %v3600_v41  ;;  %v6368_v41 = vld [vmem:[%s7471_s6 + $0x1c0] sm:$0xff]   ;;  %v7325_v49 = vld [vmem:[#allocation2 + $0x14] sm:$0x1] }
 0x2a1   : > { %5916 = vmatprep.subr.bf16.mxu1 %v6350_v9  ;;  %v3969_v40 = vrot.slane %v3967_v32, 4  ;;  %v3972_v27 = vrot.slane %v3970_v33, 5 }
 0x2a3   : > { %5909 = vmatmul.mubr.bf16.vlgmr.msra.gmra.mrb[0].mxu1 %v5165_v19  ;;  %v5182_v19 = vrot.slane %v3575_v14, 9 }
 0x2a4   : > { %5912 = vmatprep.mubr.bf16.mxu1 %v5166_v42  ;;  %5917 = vmatpush3.bf16.msra.mxu1 %v6350_v9  ;;  %v5178_v9 = vrot.slane %v3571_v61, 9  ;;  %v3624_v42 = vsel %vm7011_vm11, %v5183_v54, %v3623_v15  ;;  %v3998_v54 = vshll.u32 %v3954_v20, 16  ;;  %v6375_v15 = vld [vmem:[%s7471_s6 + $0x1e8] sm:$0xff]  }
 0x2a5   : > { %5918 = vmatprep.subr.bf16.mxu1 %v6351_v36  ;;  %v3620_v24 = vsel %vm7011_vm11, %v5182_v19, %v3619_v21  ;;  %v4037_v19 = vshrl.u32 %v3960_v53, 16  ;;  %v4040_v21 = vshll.u32 %v3960_v53, 16 }
 0x2a6   : > { %v3604_v35 = vsel %vm7011_vm11, %v5178_v9, %v3603_v10  ;;  %v5203_v25 = vcombine.low %v3620_v24, %v3624_v42  ;;  %v6371_v9 = vld [vmem:[#allocation2 + $0x40] ss:$8 sps:$4 sm:$0xff]  }
 0x2a7   : > { %v5201_v39 = vcombine.low %v3604_v35, %v3608_v22  ;;  %v3958_v22 = vld [vmem:[#allocation2 + $0x30] sm:$0xf]  ;;  %v4009_v35 = vshrl.u32 %v3956_v7, 16  ;;  %v4039_v32 = vrot.slane %v4037_v19, 4  ;;  %v4042_v33 = vrot.slane %v4040_v21, 5 }
 0x2a8   : > { %5919 = vmatpush3.bf16.msra.mxu1 %v6351_v36  ;;  %v6360_v36 = vld [vmem:[%s7471_s6 + $0x190] sm:$0xff]   ;;  %v4026_v14 = vshll.u32 %v3958_v22, 16 }
 0x2a9   : > { %5920 = vmatprep.subr.bf16.mxu1 %v6352_v34  ;;  %v4011_v42 = vrot.slane %v4009_v35, 4  ;;  %v4232_v19 = vld [vmem:[#allocation2 + $0x10] sm:$0xe] }
 0x2ab   : > { %5913 = vmatmul.mubr.bf16.gmra.mrb[4].mxu1 %v5167_v47  ;;  %v3986_v47 = vrot.slane %v3984_v4, 5  ;;  %v7355_v4 = vld [vmem:[#allocation2 + $0x34] sm:$0x1] }
 0x2ac   : > { %5921 = vmatpush3.bf16.msra.mxu1 %v6352_v34  ;;  %5932 = vmatprep.mubr.bf16.mxu1 %v5200_v50  ;;  %v6366_v34 = vld [vmem:[%s7471_s6 + $0x1b8] sm:$0xff]  }
 0x2ad   : > { %5922 = vmatprep.subr.bf16.mxu1 %v6353_v51  ;;  %v7327_v50 = vld [vmem:[#allocation2 + $0x1c] sm:$0x1]  ;;  %v3987_v57 = vor.u32 %v3986_v47, %v3983_v44 }
 0x2ae   : > { %v3990_v61 = vshll.u32 %v7327_v50, 16 }
 0x2af   : > { %v3988_v63 = vrot.slane %v3987_v57, 4  ;;  %v4043_v57 = vor.u32 %v4042_v33, %v4039_v32  ;;  %v6382_v32 = vld [vmem:[%s7471_s6 + $0x210] sm:$0xff]  }
 0x2b0   : > { %5923 = vmatpush3.bf16.msra.mxu1 %v6353_v51  ;;  %v3973_v51 = vor.u32 %v3972_v27, %v3969_v40  ;;  %v3992_v1 = vrot.slane %v3990_v61, 5 }
 0x2b1   : > { %5924 = vmatprep.subr.bf16.mxu1 %v6354_v52 }
 0x2b2   : > { %v3993_v10 = vsel %vm6566_vm2, %v3988_v63, %v3992_v1 }
 0x2b4   : > { %5925 = vmatpush3.bf16.msra.mxu1 %v6354_v52  ;;  %v6367_v52 = vld [vmem:[#allocation2 + $0x20] ss:$8 sps:$4 sm:$0xff]  }
 0x2b5   : > { %5926 = vmatprep.subr.bf16.mxu1 %v6355_v55 }
 0x2b8   : > { %5927 = vmatpush3.bf16.msra.mxu1 %v6355_v55  ;;  %v6370_v55 = vld [vmem:[%s7471_s6 + $0x1c8] sm:$0xff]  }
 0x2b9   : > { %5928 = vmatprep.subr.bf16.mxu1 %v6356_v56 }
 0x2bc   : > { %5929 = vmatpush3.bf16.msra.mxu1 %v6356_v56  ;;  %v3976_v56 = vshll.u32 %v7325_v49, 16 }
 0x2bd   : > { %5930 = vmatprep.subr.bf16.mxu1 %v6357_v59 }
 0x2be   : > { %v3978_v62 = vrot.slane %v3976_v56, 5  ;;  %v4032_v56 = vshll.u32 %v7355_v4, 16 }
 0x2c0   : > { %5931 = vmatpush3.bf16.msra.mxu1 %v6357_v59  ;;  %v3974_v59 = vrot.slane %v3973_v51, 4  ;;  %v4018_v51 = vshll.u32 %v7353_v3, 16 }
 0x2c1   : > { %5940 = vmatprep.subr.bf16.mxu1 %v6358_v11 }
 0x2c2   : > { %v3979_v0 = vsel %vm6566_vm2, %v3974_v59, %v3978_v62 }
 0x2c3   : > { %5933 = vmatmul.mubr.bf16.vlgmr.msra.gmra.mrb[0].mxu1 %v5201_v39  ;;  %v5256_v13 = vcombine.low %v3979_v0, %v3993_v10  ;;  %v4012_v39 = vshll.u32 %v3956_v7, 16  ;;  %v4020_v10 = vrot.slane %v4018_v51, 5  ;;  %v4034_v7 = vrot.slane %v4032_v56, 5  ;;  %v6388_v51 = vld [vmem:[%s7471_s6 + $0x228] sm:$0xff]  }
 0x2c4   : > { %5936 = vmatprep.mubr.bf16.mxu1 %v5202_v23  ;;  %5941 = vmatpush3.bf16.msra.mxu1 %v6358_v11  ;;  %v6373_v11 = vld [vmem:[%s7471_s6 + $0x1d8] sm:$0xff]   ;;  %v3995_v23 = vshrl.u32 %v3954_v20, 16  ;;  %v4235_v56 = vld [vmem:[#allocation2 + $0x28] sm:$0xe] }
 0x2c5   : > { %5942 = vmatprep.subr.bf16.mxu1 %v6359_v45  ;;  %v4014_v24 = vrot.slane %v4012_v39, 5 }
 0x2c7   : > { %v4015_v37 = vor.u32 %v4014_v24, %v4011_v42  ;;  %v6380_v42 = vld [vmem:[%s7471_s6 + $0x208] sm:$0xff]  }
 0x2c8   : > { %5943 = vmatpush3.bf16.msra.mxu1 %v6359_v45  ;;  %v4023_v45 = vshrl.u32 %v3958_v22, 16  ;;  %v4044_v22 = vrot.slane %v4043_v57, 4  ;;  %v4236_v57 = vld [vmem:[#allocation2 + $0x30] sm:$0xe] }
 0x2c9   : > { %5944 = vmatprep.subr.bf16.mxu1 %v6360_v36 }
 0x2cb   : > { %5937 = vmatmul.mubr.bf16.gmra.mrb[4].mxu1 %v5203_v25  ;;  %v4025_v25 = vrot.slane %v4023_v45, 4 }
 0x2cc   : > { %5945 = vmatpush3.bf16.msra.mxu1 %v6360_v36  ;;  %5956 = vmatprep.mubr.bf16.mxu1 %v6361_v28  ;;  %v3964_v36 = vld [vmem:[#allocation2 + $0x48] sm:$0xf]  ;;  %v3962_v28 = vld [vmem:[#allocation2 + $0x40] sm:$0xf] }
 0x2cd   : > { %5946 = vmatprep.subr.bf16.mxu1 %v6362_v12  ;;  %v4065_v8 = vshrl.u32 %v3964_v36, 16  ;;  %v4051_v40 = vshrl.u32 %v3962_v28, 16  ;;  %v4054_v27 = vshll.u32 %v3962_v28, 16 }
 0x2cf   : > { %v4053_v62 = vrot.slane %v4051_v40, 4  ;;  %v4056_v63 = vrot.slane %v4054_v27, 5 }
 0x2d0   : > { %5947 = vmatpush3.bf16.msra.mxu1 %v6362_v12  ;;  %v4028_v12 = vrot.slane %v4026_v14, 5 }
 0x2d1   : > { %5948 = vmatprep.subr.bf16.mxu1 %v6363_v31  ;;  %v4057_v53 = vor.u32 %v4056_v63, %v4053_v62  ;;  %v4237_v62 = vld [vmem:[#allocation2 + $0x38] sm:$0xe]  ;;  %v5272_v63 = vrot.slane %v4236_v57, 9 }
 0x2d2   : > { %v4029_v44 = vor.u32 %v4028_v12, %v4025_v25 }
 0x2d3   : > { %v4058_v25 = vrot.slane %v4057_v53, 4 }
 0x2d4   : > { %5949 = vmatpush3.bf16.msra.mxu1 %v6363_v31  ;;  %v3997_v31 = vrot.slane %v3995_v23, 4  ;;  %v4030_v0 = vrot.slane %v4029_v44, 4 }
 0x2d5   : > { %5950 = vmatprep.subr.bf16.mxu1 %v6364_v43 }
 0x2d6   : > { %v4035_v14 = vsel %vm6566_vm2, %v4030_v0, %v4034_v7  ;;  %v4274_v0 = vrot.slane %v7355_v4, 5 }
 0x2d8   : > { %5951 = vmatpush3.bf16.msra.mxu1 %v6364_v43  ;;  %v4000_v43 = vrot.slane %v3998_v54, 5 }
 0x2d9   : > { %5952 = vmatprep.subr.bf16.mxu1 %v6365_v38 }
 0x2da   : > { %v4001_v47 = vor.u32 %v4000_v43, %v3997_v31  ;;  %v4233_v31 = vld [vmem:[#allocation2 + $0x18] sm:$0xe]  ;;  %v5268_v43 = vrot.slane %v4232_v19, 9 }
 0x2db   : > { %v5269_v33 = vrot.slane %v4233_v31, 9 }
 0x2dc   : > { %5953 = vmatpush3.bf16.msra.mxu1 %v6365_v38  ;;  %v6376_v38 = vld [vmem:[%s7471_s6 + $0x1f0] sm:$0xff]  }
 0x2dd   : > { %5954 = vmatprep.subr.bf16.mxu1 %v6366_v34 }
 0x2e0   : > { %5955 = vmatpush3.bf16.msra.mxu1 %v6366_v34  ;;  %v4068_v34 = vshll.u32 %v3964_v36, 16 }
 0x2e1   : > { %5964 = vmatprep.subr.bf16.mxu1 %v6368_v41 }
 0x2e2   : > { %v4070_v59 = vrot.slane %v4068_v34, 5  ;;  %v4262_v34 = vrot.slane %v7327_v50, 5 }
 0x2e3   : > { %5957 = vmatmul.mubr.bf16.vlgmr.msra.gmra.mrb[0].mxu1 %v6367_v52  ;;  %v7360_v52 = vld [vmem:[#allocation2 + $0x3c] sm:$0x1] }
 0x2e4   : > { %5960 = vmatprep.mubr.bf16.mxu1 %v6369_v60  ;;  %5965 = vmatpush3.bf16.msra.mxu1 %v6368_v41  ;;  %v7357_v41 = vld [vmem:[#allocation2 + $0x24] sm:$0x1]  ;;  %v4067_v60 = vrot.slane %v4065_v8, 4  ;;  %v4046_v1 = vshll.u32 %v7360_v52, 16  ;;  %v4258_v8 = vrot.slane %v7325_v49, 5  ;;  %v4263_v44 = vsel %vm7011_vm11, %v5269_v33, %v4262_v34 }
 0x2e5   : > { %5966 = vmatprep.subr.bf16.mxu1 %v6370_v55  ;;  %v4004_v61 = vshll.u32 %v7357_v41, 16 }
 0x2e6   : > { %v4071_v20 = vor.u32 %v4070_v59, %v4067_v60  ;;  %v4048_v23 = vrot.slane %v4046_v1, 5  ;;  %v4259_v49 = vsel %vm7011_vm11, %v5268_v43, %v4258_v8  ;;  %v6392_v60 = vld [vmem:[%s7471_s6 + $0x238] sm:$0xff]   ;;  %v4234_v59 = vld [vmem:[#allocation2 + $0x20] sm:$0xe] }
 0x2e7   : > { %v4006_v35 = vrot.slane %v4004_v61, 5  ;;  %v5292_v50 = vcombine.low %v4259_v49, %v4263_v44  ;;  %v5271_v61 = vrot.slane %v4235_v56, 9  ;;  %v5270_v1 = vrot.slane %v4234_v59, 9 }
 0x2e8   : > { %5967 = vmatpush3.bf16.msra.mxu1 %v6370_v55  ;;  %v6377_v55 = vld [vmem:[%s7471_s6 + $0x1f8] sm:$0xff]   ;;  %v4049_v36 = vsel %vm6566_vm2, %v4044_v22, %v4048_v23  ;;  %v4072_v12 = vrot.slane %v4071_v20, 4  ;;  %v4239_v22 = vld [vmem:[#allocation2 + $0x48] sm:$0xe]  ;;  %v4275_v20 = vsel %vm7011_vm11, %v5272_v63, %v4274_v0 }
 0x2e9   : > { %5968 = vmatprep.subr.bf16.mxu1 %v6372_v48  ;;  %v5258_v24 = vcombine.low %v4035_v14, %v4049_v36  ;;  %v5317_v36 = vld [vmem:[%s7474_s9] ss:$0 sm:$0xff] }
 0x2eb   : > { %5961 = vmatmul.mubr.bf16.gmra.mrb[4].mxu1 %v6371_v9  ;;  %v4002_v9 = vrot.slane %v4001_v47, 4  ;;  %v6384_v47 = vld [vmem:[%s7471_s6 + $0x218] sm:$0xff]  }
 0x2ec   : > { %5969 = vmatpush3.bf16.msra.mxu1 %v6372_v48  ;;  %5980 = vmatprep.mubr.bf16.mxu1 %v5256_v13  ;;  %v4016_v48 = vrot.slane %v4015_v37, 4  ;;  %v6378_v13 = vld [vmem:[%s7471_s6 + $0x200] sm:$0xff]  }
 0x2ed   : > { %5970 = vmatprep.subr.bf16.mxu1 %v6373_v11  ;;  %v4007_v54 = vsel %vm6566_vm2, %v4002_v9, %v4006_v35  ;;  %v4266_v9 = vrot.slane %v7357_v41, 5 }
 0x2ee   : > { %v4021_v39 = vsel %vm6566_vm2, %v4016_v48, %v4020_v10  ;;  %v4270_v48 = vrot.slane %v7353_v3, 5  ;;  %v5273_v10 = vrot.slane %v4237_v62, 9  ;;  %v4238_v3 = vld [vmem:[#allocation2 + $0x40] sm:$0xe] }
 0x2ef   : > { %v5257_v21 = vcombine.low %v4007_v54, %v4021_v39  ;;  %v4267_v4 = vsel %vm7011_vm11, %v5270_v1, %v4266_v9  ;;  %v5274_v53 = vrot.slane %v4238_v3, 9 }
 0x2f0   : > { %5971 = vmatpush3.bf16.msra.mxu1 %v6373_v11  ;;  %v7368_v11 = vld [vmem:[#allocation2 + $0x4c] sm:$0x1]  ;;  %v4271_v7 = vsel %vm7011_vm11, %v5271_v61, %v4270_v48 }
 0x2f1   : > { %5972 = vmatprep.subr.bf16.mxu1 %v6374_v30  ;;  %v4074_v45 = vshll.u32 %v7368_v11, 16  ;;  %v5293_v35 = vcombine.low %v4267_v4, %v4271_v7  ;;  %v4286_v14 = vrot.slane %v7368_v11, 5 }
 0x2f3   : > { %v4076_v28 = vrot.slane %v4074_v45, 5 }
 0x2f4   : > { %5973 = vmatpush3.bf16.msra.mxu1 %v6374_v30  ;;  %v7373_v30 = vld [vmem:[#allocation2 + $0x44] sm:$0x1] }
 0x2f5   : > { %5974 = vmatprep.subr.bf16.mxu1 %v6375_v15  ;;  %v4077_v40 = vsel %vm6566_vm2, %v4072_v12, %v4076_v28  ;;  %v4282_v45 = vrot.slane %v7373_v30, 5 }
 0x2f7   : > { %v4283_v23 = vsel %vm7011_vm11, %v5274_v53, %v4282_v45 }
 0x2f8   : > { %5975 = vmatpush3.bf16.msra.mxu1 %v6375_v15  ;;  %v4060_v15 = vshll.u32 %v7373_v30, 16 }
 0x2f9   : > { %5976 = vmatprep.subr.bf16.mxu1 %v6376_v38 }
 0x2fc   : > { %5977 = vmatpush3.bf16.msra.mxu1 %v6376_v38  ;;  %v4062_v38 = vrot.slane %v4060_v15, 5  ;;  %v6396_v15 = vld [vmem:[%s6563_s12 + $0x20] ss:$8 sps:$4 sm:$0xff]   ;;  %s5320_s12 = sshll.u32 %s7485_s14, 5 }
 0x2fd   : > { %5978 = vmatprep.subr.bf16.mxu1 %v6377_v55  ;;  %s419_s18 = scalar_lea.vmem %s7475_s10, %s5320_s12 }
 0x2fe   : > { %v4063_v37 = vsel %vm6566_vm2, %v4058_v25, %v4062_v38 }
 0x2ff   : > { %v5259_v27 = vcombine.low %v4063_v37, %v4077_v40 }
 0x300   : > { %5979 = vmatpush3.bf16.msra.mxu1 %v6377_v55  ;;  %v6390_v55 = vld [vmem:[%s7471_s6 + $0x230] sm:$0xff]  }
 0x301   : > { %5988 = vmatprep.subr.bf16.mxu1 %v6378_v13 }
 0x303   : > { %5981 = vmatmul.mubr.bf16.vlgmr.msra.gmra.mrb[0].mxu1 %v5257_v21 }
 0x304   : > { %5984 = vmatprep.mubr.bf16.mxu1 %v5258_v24  ;;  %5989 = vmatpush3.bf16.msra.mxu1 %v6378_v13  ;;  %v4278_v13 = vrot.slane %v7360_v52, 5  ;;  %v5275_v52 = vrot.slane %v4239_v22, 9 }
 0x305   : > { %5990 = vmatprep.subr.bf16.mxu1 %v6380_v42 }
 0x306   : > { %v4279_v41 = vsel %vm7011_vm11, %v5273_v10, %v4278_v13  ;;  %v4287_v54 = vsel %vm7011_vm11, %v5275_v52, %v4286_v14 }
 0x307   : > { %v5294_v39 = vcombine.low %v4275_v20, %v4279_v41  ;;  %v5295_v19 = vcombine.low %v4283_v23, %v4287_v54 }
 0x308   : > { %5991 = vmatpush3.bf16.msra.mxu1 %v6380_v42 }
 0x309   : > { %5992 = vmatprep.subr.bf16.mxu1 %v6382_v32 }
 0x30b   : > { %5985 = vmatmul.mubr.bf16.gmra.mrb[4].mxu1 %v5259_v27 }
 0x30c   : > { %5993 = vmatpush3.bf16.msra.mxu1 %v6382_v32  ;;  %6004 = vmatprep.mubr.bf16.mxu1 %v5292_v50 }
 0x30d   : > { %5994 = vmatprep.subr.bf16.mxu1 %v6384_v47 }
 0x310   : > { %5995 = vmatpush3.bf16.msra.mxu1 %v6384_v47 }
 0x311   : > { %5996 = vmatprep.subr.bf16.mxu1 %v6386_v46 }
 0x314   : > { %5997 = vmatpush3.bf16.msra.mxu1 %v6386_v46 }
 0x315   : > { %5998 = vmatprep.subr.bf16.mxu1 %v6388_v51 }
 0x318   : > { %5999 = vmatpush3.bf16.msra.mxu1 %v6388_v51 }
 0x319   : > { %6000 = vmatprep.subr.bf16.mxu1 %v6390_v55 }
 0x31c   : > { %6001 = vmatpush3.bf16.msra.mxu1 %v6390_v55 }
 0x31d   : > { %6002 = vmatprep.subr.bf16.mxu1 %v6392_v60 }
 0x320   : > { %6003 = vmatpush3.bf16.msra.mxu1 %v6392_v60 }
 0x321   : > { %6036 = vmatprep.subr.bf16.mxu1 %v7143_v6 }
 0x323   : > { %6005 = vmatmul.mubr.bf16.vlgmr.msra.gmra.mrb[0].mxu1 %v5293_v35 }
 0x324   : > { %6008 = vmatprep.mubr.bf16.mxu1 %v5294_v39  ;;  %6044 = vmatpush3.bf16.msra.mxu1 %v7143_v6 }
 0x325   : > { %6037 = vmatprep.subr.bf16.mxu1 %v7155_v2 }
 0x328   : > { %6045 = vmatpush3.bf16.msra.mxu1 %v7155_v2 }
 0x329   : > { %6038 = vmatprep.subr.bf16.mxu1 %v7167_v58 }
 0x32b   : > { %6009 = vmatmul.mubr.bf16.gmra.mrb[4].mxu1 %v5295_v19 }
 0x32c   : > { %6046 = vmatpush3.bf16.msra.mxu1 %v7167_v58  ;;  %6032 = vmatprep.mubr.bf16.mxu1 %v6396_v15 }
 0x32d   : > { %6039 = vmatprep.subr.bf16.mxu1 %v7177_v17 }
 0x330   : > { %6047 = vmatpush3.bf16.msra.mxu1 %v7177_v17 }
 0x331   : > { %6040 = vmatprep.subr.bf16.mxu1 %v7190_v29 }
 0x334   : > { %6048 = vmatpush3.bf16.msra.mxu1 %v7190_v29  ;;  %v5304_v29 = vld [vmem:[%s7472_s7] ss:$0 sm:$0xff] }
 0x335   : > { %6041 = vmatprep.subr.bf16.mxu1 %v7206_v26 }
 0x338   : > { %6049 = vmatpush3.bf16.msra.mxu1 %v7206_v26 }
 0x339   : > { %6042 = vmatprep.subr.bf16.mxu1 %v7219_v5 }
 0x33c   : > { %6050 = vmatpush3.bf16.msra.mxu1 %v7219_v5 }
 0x33d   : > { %6043 = vmatprep.subr.bf16.mxu1 %v7240_v18 }
 0x340   : > { %6051 = vmatpush3.bf16.msra.mxu1 %v7240_v18 }
 0x343   : > { %6033 = vmatmul.mubr.bf16.vlgmr.msra.gmra.mrb[4].mxu1 %v6397_v16 }
 0x370   : > { %v6030_v6 = vpop.f32.mrb[8].mxu0 }
 0x371   : > { %v4587_v2 = vpop.f32.mrb[9].mxu0 }
 0x372   : > { %v6031_v58 = vpop.f32.mrb[10].mxu0 }
 0x373   : > { %v4590_v17 = vpop.f32.mrb[11].mxu0 }
 0x3f6   : > { %v6006_v26 = vpop.f32.mrb[0].mxu1 }
 0x3f7   : > { %v6052_v11 = vadd.f32 %v6006_v26, %v5304_v29  ;;  %v4403_v30 = vpop.f32.mrb[1].mxu1 }
 0x3f8   : > { %v6054_v21 = vadd.f32 %v5304_v29, %v4403_v30  ;;  %v6007_v5 = vpop.f32.mrb[2].mxu1 }
 0x3f9   : > { %v6056_v18 = vadd.f32 %v6007_v5, %v5304_v29  ;;  %v6053_v42 = vadd.f32 %v6052_v11, %v6030_v6  ;;  %v4406_v24 = vpop.f32.mrb[3].mxu1 }
 0x3fa   : > { %v6058_v25 = vadd.f32 %v5304_v29, %v4406_v24  ;;  %v6055_v12 = vadd.f32 %v6054_v21, %v4587_v2 }
 0x3fb   : > { %v4635_v28 = vadd.f32 %v6053_v42, %v5317_v36  ;;  %v6057_v31 = vadd.f32 %v6056_v18, %v6031_v58 }
 0x3fc   : > { %v4633_v43 = vadd.f32 %v6055_v12, %v5317_v36  ;;  %v6059_v8 = vadd.f32 %v6058_v25, %v4590_v17 }
 0x3fd   : > { %v4636_v38 = vadd.f32 %v6057_v31, %v5317_v36  ;;  %v4643_v33 = vmax.f32 %v4635_v28, 0.0 }
 0x3fe   : > { %v4634_v32 = vadd.f32 %v6059_v8, %v5317_v36  ;;  %v4641_v37 = vmax.f32 %v4633_v43, 0.0 }
 0x3ff   : > { %v4644_v34 = vmax.f32 %v4636_v38, 0.0 }
 0x400   : > { %v4642_v40 = vmax.f32 %v4634_v32, 0.0 }
 0x401   : > { %v5337_v49 = vpack.c.bf16 %v4644_v34, %v4643_v33 }
 0x402   : > { %v5332_v27 = vpack.c.bf16 %v4642_v40, %v4641_v37 }
 0x403   : > { %5349 = vst [vmem:[%s419_s18 + $0x8] sm:$0xff] %v5337_v49  }
 0x404   : > { %5333 = vst [vmem:[%s419_s18] sm:$0xff] %v5332_v27  }
 0x416   : > { %v6034_v44 = vpop.f32.mrb[4].mxu1 }
 0x417   : > { %v6060_v47 = vadd.f32 %v6034_v44, %v5304_v29  ;;  %v4603_v50 = vpop.f32.mrb[5].mxu1 }
 0x418   : > { %v6061_v46 = vadd.f32 %v5304_v29, %v4603_v50  ;;  %v6035_v51 = vpop.f32.mrb[6].mxu1 }
 0x419   : > { %v4639_v55 = vadd.f32 %v6060_v47, %v5317_v36  ;;  %v6062_v56 = vadd.f32 %v6035_v51, %v5304_v29  ;;  %v4606_v57 = vpop.f32.mrb[7].mxu1 }
 0x41a   : > { %v4637_v60 = vadd.f32 %v6061_v46, %v5317_v36  ;;  %v6063_v59 = vadd.f32 %v5304_v29, %v4606_v57 }
 0x41b   : > { %v4640_v61 = vadd.f32 %v6062_v56, %v5317_v36  ;;  %v4647_v62 = vmax.f32 %v4639_v55, 0.0 }
 0x41c   : > { %v4638_v48 = vadd.f32 %v6063_v59, %v5317_v36  ;;  %v4645_v0 = vmax.f32 %v4637_v60, 0.0 }
 0x41d   : > { %v4648_v63 = vmax.f32 %v4640_v61, 0.0 }
 0x41e   : > { %v4646_v1 = vmax.f32 %v4638_v48, 0.0 }
 0x41f   : > { %v5347_v9 = vpack.c.bf16 %v4648_v63, %v4647_v62 }
 0x420   : > { %v5342_v10 = vpack.c.bf16 %v4646_v1, %v4645_v0 }
 0x421   : > { %5351 = vst [vmem:[%s419_s18 + $0x18] sm:$0xff] %v5347_v9  }
 0x422   : > { %5350 = vst [vmem:[%s419_s18 + $0x10] sm:$0xff] %v5342_v10  }
 0x423 PF: > { %s20_s13 = sadd.s32 1, %s6404_s13  }
 0x424   : > { %p17_p4 = scmp.ge.s32.totalorder %s20_s13, 4  }
 0x426   :  { %19 = sbr.rel (!%p17_p4) target bundleno = 1 (0x1), region = 119 }

</bundles_post_ra>
